<compile_context>
chip_gen: v7x
topology: tpu7x:2x2x1
jax: 0.10.0
libtpu: 0.0.40
codegen_flags: <defaults>
</compile_context>

<pallas_src>
import functools
import math

import jax
import jax.numpy as jnp
from jax.experimental import pallas as pl
from jax.experimental.pallas import tpu as pltpu


def _mhsa_kernel(xq_ref, xkv_ref, wq_ref, bq_ref, wk_ref, wv_ref, bv_ref,
                 o_ref, q_s, k_cache, v_cache, ml_s, acc_s,
                 *, nheads, ndim, vdim, block_q, block_kv, scale, mxu_dtype,
                 approx_recip):
    """One grid step = (batch b, query tile qi, key/value tile ki).

    xq_ref : (1, block_q,  C)   query-side rows of x (resident across ki)
    xkv_ref: (1, block_kv, C)   key/value rows (streamed only while qi == 0)
    wq/wk  : (C, qk_dim), bq: (1, qk_dim), wv: (C, out_channel), bv: (1, oc)
    o_ref  : (1, block_q, out_channel)  lane-dense, heads concatenated
    q_s    : (H, block_q, ndim)  mxu_dtype  scaled Q of the current query tile
    k_cache: (H, N, ndim)        mxu_dtype  projected K, whole sequence
    v_cache: (H, N, vdim)        mxu_dtype  projected V (+bias), whole sequence
    ml_s   : (H, block_q, 2)     f32  packed online-softmax max / denom
    acc_s  : (H, block_q, vdim)  f32  online-softmax accumulator
    """
    qi = pl.program_id(1)
    ki = pl.program_id(2)
    off = pl.multiple_of(ki * block_kv, block_kv)

    # Phase 1 - project K/V for this KV tile ONCE PER BATCH (only while
    # qi == 0) and stash them head-major in the persistent VMEM cache.
    # K bias is dropped: q.bk is constant across keys and cancels in softmax.
    @pl.when(qi == 0)
    def _fill_kv_cache():
        xkv = xkv_ref[0]                                   # (bkv, C) mxu_dtype
        k = jnp.dot(xkv, wk_ref[...], preferred_element_type=jnp.float32)
        v = jnp.dot(xkv, wv_ref[...],
                    preferred_element_type=jnp.float32) + bv_ref[...]
        for h in range(nheads):                            # static unroll
            k_cache[h, pl.ds(off, block_kv), :] = (
                k[:, h * ndim:(h + 1) * ndim].astype(k_cache.dtype))
            v_cache[h, pl.ds(off, block_kv), :] = (
                v[:, h * vdim:(h + 1) * vdim].astype(v_cache.dtype))

    # Phase 2 - project Q once per query tile (softmax scale folded in) and
    # reset the online-softmax state.  Q is stored directly in mxu_dtype.
    @pl.when(ki == 0)
    def _init_q():
        xq = xq_ref[0]                                     # (bq, C) mxu_dtype
        q = jnp.dot(xq, wq_ref[...], preferred_element_type=jnp.float32)
        q = (q + bq_ref[...]) * scale
        for h in range(nheads):                            # static unroll
            q_s[h] = q[:, h * ndim:(h + 1) * ndim].astype(q_s.dtype)
        neg_inf = jnp.full((nheads, block_q, 1), -jnp.inf, dtype=jnp.float32)
        ml_s[:, :, 0:1] = neg_inf                          # running max m
        ml_s[:, :, 1:2] = jnp.zeros_like(neg_inf)          # running denom l
        acc_s[...] = jnp.zeros_like(acc_s)

    # Phase 3 - online-softmax flash update for the current KV tile.  All
    # heads go through two batched matmuls (batch dim = heads): no per-head
    # lane slices or tiny per-head dots in the hot loop.
    q3 = q_s[...]                                          # (H, bq,  ndim)
    k3 = k_cache[:, pl.ds(off, block_kv), :]               # (H, bkv, ndim)
    v3 = v_cache[:, pl.ds(off, block_kv), :]               # (H, bkv, vdim)

    s = jnp.einsum("hqd,hkd->hqk", q3, k3,
                   preferred_element_type=jnp.float32)      # (H, bq, bkv)
    m_prev = ml_s[:, :, 0:1]
    l_prev = ml_s[:, :, 1:2]
    m_new = jnp.maximum(m_prev, jnp.max(s, axis=-1, keepdims=True))
    alpha = jnp.exp(m_prev - m_new)
    p = jnp.exp(s - m_new)
    ml_s[:, :, 0:1] = m_new
    ml_s[:, :, 1:2] = alpha * l_prev + jnp.sum(p, axis=-1, keepdims=True)
    acc_s[...] = alpha * acc_s[...] + jnp.einsum(
        "hqk,hkd->hqd", p.astype(mxu_dtype), v3,
        preferred_element_type=jnp.float32)

    # Phase 4 - finalize: normalize once per query tile and write the
    # lane-dense output tile with heads concatenated along channels
    # (matches the torch .transpose(1,2).reshape layout).
    @pl.when(ki == pl.num_programs(2) - 1)
    def _finalize():
        inv = pl.reciprocal(ml_s[:, :, 1:2], approx=approx_recip)  # (H,bq,1)
        out = acc_s[...] * inv                                     # (H,bq,dv)
        for h in range(nheads):                                    # unroll
            o_ref[0, :, h * vdim:(h + 1) * vdim] = out[h].astype(o_ref.dtype)


def multi_head_self_attention(x, params, *, nheads, qk_dim, out_channel,
                              scale=True, block_q=256, block_kv=256,
                              mxu_dtype=jnp.bfloat16,
                              vmem_limit_bytes=48 * 1024 * 1024):
    """x: (B, N, C) -> (B, N, out_channel). Matches the PyTorch module.

    Defaults target v6e/v7x (256-wide tiles for the 256x256 MXU, bf16 MXU
    operands with f32 accumulation).  On v5e, block_q=block_kv=128 keeps the
    single f32 EUP from becoming the binding unit.
    """
    assert x.ndim == 3
    B, N, C = x.shape
    assert qk_dim % nheads == 0 and out_channel % nheads == 0
    ndim = qk_dim // nheads
    vdim = out_channel // nheads
    scale_val = 1.0 / math.sqrt(ndim) if scale else 1.0

    block_q = min(block_q, N)
    block_kv = min(block_kv, N)
    # TODO(synk): pad/mask ragged sequence tails; for now require exact tiling.
    assert N % block_q == 0 and N % block_kv == 0
    grid = (B, N // block_q, N // block_kv)

    out_dtype = x.dtype
    # Cast x and weights once in the wrapper (halves HBM traffic / weight
    # VMEM residency vs. per-step in-kernel casts).  Biases stay f32 (added
    # to f32 accumulators).
    xin = x.astype(mxu_dtype)
    wq = params["wq"].astype(mxu_dtype)
    wk = params["wk"].astype(mxu_dtype)
    wv = params["wv"].astype(mxu_dtype)
    bq = params["bq"].reshape(1, qk_dim).astype(jnp.float32)
    bv = params["bv"].reshape(1, out_channel).astype(jnp.float32)
    # params["bk"], if present, is intentionally unused: it cancels in softmax.

    kernel = functools.partial(
        _mhsa_kernel, nheads=nheads, ndim=ndim, vdim=vdim,
        block_q=block_q, block_kv=block_kv, scale=scale_val,
        mxu_dtype=mxu_dtype,
        # EUP fast-path reciprocal on the bf16 default path; exact on f32 so
        # the tight numerical check below stays valid.
        approx_recip=(mxu_dtype != jnp.float32))

    # TODO(synk): for very long N on v7x (64 MiB VMEM) the head-major K/V
    # cache (lane-padded to 128) may not fit; fall back to wrapper-side XLA
    # projections + a pure flash kernel, or tile the projection K-dim.
    return pl.pallas_call(
        kernel,
        out_shape=jax.ShapeDtypeStruct((B, N, out_channel), out_dtype),
        grid_spec=pltpu.PrefetchScalarGridSpec(
            num_scalar_prefetch=0,
            grid=grid,
            in_specs=[
                # x, query-side rows (block index constant along ki).
                pl.BlockSpec((1, block_q, C), lambda b, qi, ki: (b, qi, 0)),
                # x, key/value-side rows: streamed only while qi == 0; the
                # index collapses to block 0 afterwards so x is not re-DMA'd.
                pl.BlockSpec((1, block_kv, C),
                             lambda b, qi, ki: (b, jnp.where(qi == 0, ki, 0), 0)),
                # Projection weights/biases: constant index_maps keep them
                # resident in VMEM for the whole grid (DMA'd once).
                pl.BlockSpec((C, qk_dim), lambda b, qi, ki: (0, 0)),       # wq
                pl.BlockSpec((1, qk_dim), lambda b, qi, ki: (0, 0)),       # bq
                pl.BlockSpec((C, qk_dim), lambda b, qi, ki: (0, 0)),       # wk
                pl.BlockSpec((C, out_channel), lambda b, qi, ki: (0, 0)),  # wv
                pl.BlockSpec((1, out_channel), lambda b, qi, ki: (0, 0)),  # bv
            ],
            # Lane-dense output tile with heads concatenated -> no wrapper
            # transpose/reshape pass after the kernel.
            out_specs=pl.BlockSpec((1, block_q, out_channel),
                                   lambda b, qi, ki: (b, qi, 0)),
            scratch_shapes=[
                pltpu.VMEM((nheads, block_q, ndim), mxu_dtype),   # scaled Q
                pltpu.VMEM((nheads, N, ndim), mxu_dtype),         # K cache
                pltpu.VMEM((nheads, N, vdim), mxu_dtype),         # V cache
                pltpu.VMEM((nheads, block_q, 2), jnp.float32),    # packed m,l
                pltpu.VMEM((nheads, block_q, vdim), jnp.float32), # accumulator
            ],
        ),
        compiler_params=pltpu.CompilerParams(
            # Only the batch axis is sharded across TensorCores: the K/V
            # cache is filled at qi == 0 and must be consumed by the same
            # core, so qi cannot be "parallel"; ki accumulates into the same
            # output block.  (On v7x, B >= 2 keeps both TCs busy.)
            dimension_semantics=("parallel", "arbitrary", "arbitrary"),
            vmem_limit_bytes=vmem_limit_bytes),
    )(xin, xin, wq, bq, wk, wv, bv)


def _reference(x, params, *, nheads, qk_dim, out_channel, scale=True):
    """Pure-JAX reference mirroring the PyTorch forward exactly."""
    B, N, C = x.shape
    ndim = qk_dim // nheads
    vdim = out_channel // nheads
    s = 1.0 / math.sqrt(ndim) if scale else 1.0
    Q = x @ params["wq"] + params["bq"]
    K = x @ params["wk"] + params["bk"]
    V = x @ params["wv"] + params["bv"]
    Q = Q.reshape(B, N, nheads, ndim).transpose(0, 2, 1, 3)   # (B,H,N,d)
    K = K.reshape(B, N, nheads, ndim).transpose(0, 2, 3, 1)   # (B,H,d,N)
    V = V.reshape(B, N, nheads, vdim).transpose(0, 2, 1, 3)   # (B,H,N,dv)
    QK = jax.nn.softmax(jnp.matmul(Q, K) * s, axis=3)
    return jnp.matmul(QK, V).transpose(0, 2, 1, 3).reshape(B, N, out_channel)


if __name__ == "__main__":
    # Small shapes; N=64 with 32-wide tiles exercises the multi-tile q/kv
    # grid, the per-batch K/V cache fill (qi == 0) and its reuse (qi == 1).
    B, N, C = 2, 64, 32
    qk_dim, out_channel, nheads = 64, 64, 4

    key = jax.random.PRNGKey(0)
    kx, kq, kk, kv, kbq, kbk, kbv = jax.random.split(key, 7)

    x = jax.random.normal(kx, (B, N, C), dtype=jnp.float32)
    params = {
        "wq": jax.random.normal(kq, (C, qk_dim), dtype=jnp.float32) * 0.1,
        "wk": jax.random.normal(kk, (C, qk_dim), dtype=jnp.float32) * 0.1,
        "wv": jax.random.normal(kv, (C, out_channel), dtype=jnp.float32) * 0.1,
        "bq": jax.random.normal(kbq, (qk_dim,), dtype=jnp.float32) * 0.01,
        "bk": jax.random.normal(kbk, (qk_dim,), dtype=jnp.float32) * 0.01,
        "bv": jax.random.normal(kbv, (out_channel,), dtype=jnp.float32) * 0.01,
    }

    ref = _reference(x, params, nheads=nheads, qk_dim=qk_dim,
                     out_channel=out_channel, scale=True)

    # Default bf16-MXU path (loose tolerance: bf16 operands, f32 accumulate).
    out_bf16 = multi_head_self_attention(
        x, params, nheads=nheads, qk_dim=qk_dim, out_channel=out_channel,
        scale=True, block_q=32, block_kv=32)
    out_bf16 = jax.block_until_ready(out_bf16)
    assert out_bf16.shape == (B, N, out_channel)
    assert jnp.allclose(out_bf16, ref, atol=3e-2, rtol=3e-2), "bf16 mismatch"

    # f32 MXU path for a tight numerical check of the kernel structure.
    out_f32 = multi_head_self_attention(
        x, params, nheads=nheads, qk_dim=qk_dim, out_channel=out_channel,
        scale=True, block_q=32, block_kv=32, mxu_dtype=jnp.float32)
    out_f32 = jax.block_until_ready(out_f32)
    assert jnp.allclose(out_f32, ref, atol=1e-4, rtol=1e-4), "f32 mismatch"

    print("KERNEL_OK")
</pallas_src>

<mosaic_0001>
module attributes {stable_mosaic.version = 11 : i64} {
  func.func @_mhsa_kernel(%arg0: i32, %arg1: i32, %arg2: i32, %arg3: memref<1x32x32xbf16, #tpu.memory_space<vmem>>, %arg4: memref<1x32x32xbf16, #tpu.memory_space<vmem>>, %arg5: memref<32x64xbf16, #tpu.memory_space<vmem>>, %arg6: memref<1x64xf32, #tpu.memory_space<vmem>>, %arg7: memref<32x64xbf16, #tpu.memory_space<vmem>>, %arg8: memref<32x64xbf16, #tpu.memory_space<vmem>>, %arg9: memref<1x64xf32, #tpu.memory_space<vmem>>, %arg10: memref<1x32x64xf32, #tpu.memory_space<vmem>>, %arg11: memref<4x32x16xbf16, #tpu.memory_space<vmem>>, %arg12: memref<4x64x16xbf16, #tpu.memory_space<vmem>>, %arg13: memref<4x64x16xbf16, #tpu.memory_space<vmem>>, %arg14: memref<4x32x2xf32, #tpu.memory_space<vmem>>, %arg15: memref<4x32x16xf32, #tpu.memory_space<vmem>>) attributes {dimension_semantics = [#tpu.dimension_semantics<parallel>, #tpu.dimension_semantics<arbitrary>, #tpu.dimension_semantics<arbitrary>], iteration_bounds = array<i64: 2, 2, 2>, scalar_prefetch = 0 : i64, scratch_operands = 5 : i64, tpu.core_type = #tpu.core_type<tc>, window_params = [{transform_indices = @transform_0, window_bounds = array<i64: 1, 32, 32>}, {transform_indices = @transform_1, window_bounds = array<i64: 1, 32, 32>}, {pipeline_mode = #tpu.pipeline_mode<synchronous>, transform_indices = @transform_2, window_bounds = array<i64: 32, 64>}, {pipeline_mode = #tpu.pipeline_mode<synchronous>, transform_indices = @transform_3, window_bounds = array<i64: 1, 64>}, {pipeline_mode = #tpu.pipeline_mode<synchronous>, transform_indices = @transform_4, window_bounds = array<i64: 32, 64>}, {pipeline_mode = #tpu.pipeline_mode<synchronous>, transform_indices = @transform_5, window_bounds = array<i64: 32, 64>}, {pipeline_mode = #tpu.pipeline_mode<synchronous>, transform_indices = @transform_6, window_bounds = array<i64: 1, 64>}, {transform_indices = @transform_7, window_bounds = array<i64: 1, 32, 64>}]} {
    %c32_i32 = arith.constant 32 : i32
    %0 = arith.muli %arg2, %c32_i32 : i32
    %1 = tpu.assume_multiple %0, 32 : i32
    %c0_i32 = arith.constant 0 : i32
    %2 = arith.cmpi eq, %arg1, %c0_i32 : i32
    %3 = arith.extui %2 : i1 to i32
    %c0_i32_0 = arith.constant 0 : i32
    %4 = arith.cmpi ne, %3, %c0_i32_0 : i32
    scf.if %4 {
      %c0_30 = arith.constant 0 : index
      %c0_31 = arith.constant 0 : index
      %c0_32 = arith.constant 0 : index
      %40 = vector.load %arg4[%c0_30, %c0_31, %c0_32] : memref<1x32x32xbf16, #tpu.memory_space<vmem>>, vector<1x32x32xbf16>
      %41 = vector.shape_cast %40 : vector<1x32x32xbf16> to vector<32x32xbf16>
      %c0_33 = arith.constant 0 : index
      %c0_34 = arith.constant 0 : index
      %42 = vector.load %arg7[%c0_33, %c0_34] : memref<32x64xbf16, #tpu.memory_space<vmem>>, vector<32x64xbf16>
      %cst_35 = arith.constant dense<0.000000e+00> : vector<32x64xf32>
      %43 = tpu.matmul %41, %42, %cst_35 {dimension_numbers = #tpu.dot_dimension_numbers<[1], [0], [0], [1], [0, 0, 1, 1], [], []>} : vector<32x32xbf16>, vector<32x64xbf16>, vector<32x64xf32> -> vector<32x64xf32>
      %c0_36 = arith.constant 0 : index
      %c0_37 = arith.constant 0 : index
      %44 = vector.load %arg8[%c0_36, %c0_37] : memref<32x64xbf16, #tpu.memory_space<vmem>>, vector<32x64xbf16>
      %cst_38 = arith.constant dense<0.000000e+00> : vector<32x64xf32>
      %45 = tpu.matmul %41, %44, %cst_38 {dimension_numbers = #tpu.dot_dimension_numbers<[1], [0], [0], [1], [0, 0, 1, 1], [], []>} : vector<32x32xbf16>, vector<32x64xbf16>, vector<32x64xf32> -> vector<32x64xf32>
      %c0_39 = arith.constant 0 : index
      %c0_40 = arith.constant 0 : index
      %46 = vector.load %arg9[%c0_39, %c0_40] : memref<1x64xf32, #tpu.memory_space<vmem>>, vector<1x64xf32>
      %47 = vector.broadcast %46 : vector<1x64xf32> to vector<32x64xf32>
      %48 = arith.addf %45, %47 : vector<32x64xf32>
      %49 = vector.extract_strided_slice %43 {offsets = [0, 0], sizes = [32, 16], strides = [1, 1]} : vector<32x64xf32> to vector<32x16xf32>
      %50 = arith.truncf %49 : vector<32x16xf32> to vector<32x16xbf16>
      %c0_41 = arith.constant 0 : index
      %51 = arith.index_cast %1 : i32 to index
      %c0_42 = arith.constant 0 : index
      %52 = vector.load %arg12[%c0_41, %51, %c0_42] : memref<4x64x16xbf16, #tpu.memory_space<vmem>>, vector<1x32x16xbf16>
      %53 = vector.shape_cast %52 : vector<1x32x16xbf16> to vector<32x16xbf16>
      %54 = vector.shape_cast %50 : vector<32x16xbf16> to vector<1x32x16xbf16>
      tpu.vector_store %arg12[%c0_41, %51, %c0_42], %54 {strides = array<i32>} : memref<4x64x16xbf16, #tpu.memory_space<vmem>>, vector<1x32x16xbf16>,
      %55 = vector.extract_strided_slice %48 {offsets = [0, 0], sizes = [32, 16], strides = [1, 1]} : vector<32x64xf32> to vector<32x16xf32>
      %56 = arith.truncf %55 : vector<32x16xf32> to vector<32x16xbf16>
      %c0_43 = arith.constant 0 : index
      %57 = arith.index_cast %1 : i32 to index
      %c0_44 = arith.constant 0 : index
      %58 = vector.load %arg13[%c0_43, %57, %c0_44] : memref<4x64x16xbf16, #tpu.memory_space<vmem>>, vector<1x32x16xbf16>
      %59 = vector.shape_cast %58 : vector<1x32x16xbf16> to vector<32x16xbf16>
      %60 = vector.shape_cast %56 : vector<32x16xbf16> to vector<1x32x16xbf16>
      tpu.vector_store %arg13[%c0_43, %57, %c0_44], %60 {strides = array<i32>} : memref<4x64x16xbf16, #tpu.memory_space<vmem>>, vector<1x32x16xbf16>,
      %61 = vector.extract_strided_slice %43 {offsets = [0, 16], sizes = [32, 16], strides = [1, 1]} : vector<32x64xf32> to vector<32x16xf32>
      %62 = arith.truncf %61 : vector<32x16xf32> to vector<32x16xbf16>
      %c1_45 = arith.constant 1 : index
      %63 = arith.index_cast %1 : i32 to index
      %c0_46 = arith.constant 0 : index
      %64 = vector.load %arg12[%c1_45, %63, %c0_46] : memref<4x64x16xbf16, #tpu.memory_space<vmem>>, vector<1x32x16xbf16>
      %65 = vector.shape_cast %64 : vector<1x32x16xbf16> to vector<32x16xbf16>
      %66 = vector.shape_cast %62 : vector<32x16xbf16> to vector<1x32x16xbf16>
      tpu.vector_store %arg12[%c1_45, %63, %c0_46], %66 {strides = array<i32>} : memref<4x64x16xbf16, #tpu.memory_space<vmem>>, vector<1x32x16xbf16>,
      %67 = vector.extract_strided_slice %48 {offsets = [0, 16], sizes = [32, 16], strides = [1, 1]} : vector<32x64xf32> to vector<32x16xf32>
      %68 = arith.truncf %67 : vector<32x16xf32> to vector<32x16xbf16>
      %c1_47 = arith.constant 1 : index
      %69 = arith.index_cast %1 : i32 to index
      %c0_48 = arith.constant 0 : index
      %70 = vector.load %arg13[%c1_47, %69, %c0_48] : memref<4x64x16xbf16, #tpu.memory_space<vmem>>, vector<1x32x16xbf16>
      %71 = vector.shape_cast %70 : vector<1x32x16xbf16> to vector<32x16xbf16>
      %72 = vector.shape_cast %68 : vector<32x16xbf16> to vector<1x32x16xbf16>
      tpu.vector_store %arg13[%c1_47, %69, %c0_48], %72 {strides = array<i32>} : memref<4x64x16xbf16, #tpu.memory_space<vmem>>, vector<1x32x16xbf16>,
      %73 = vector.extract_strided_slice %43 {offsets = [0, 32], sizes = [32, 16], strides = [1, 1]} : vector<32x64xf32> to vector<32x16xf32>
      %74 = arith.truncf %73 : vector<32x16xf32> to vector<32x16xbf16>
      %c2 = arith.constant 2 : index
      %75 = arith.index_cast %1 : i32 to index
      %c0_49 = arith.constant 0 : index
      %76 = vector.load %arg12[%c2, %75, %c0_49] : memref<4x64x16xbf16, #tpu.memory_space<vmem>>, vector<1x32x16xbf16>
      %77 = vector.shape_cast %76 : vector<1x32x16xbf16> to vector<32x16xbf16>
      %78 = vector.shape_cast %74 : vector<32x16xbf16> to vector<1x32x16xbf16>
      tpu.vector_store %arg12[%c2, %75, %c0_49], %78 {strides = array<i32>} : memref<4x64x16xbf16, #tpu.memory_space<vmem>>, vector<1x32x16xbf16>,
      %79 = vector.extract_strided_slice %48 {offsets = [0, 32], sizes = [32, 16], strides = [1, 1]} : vector<32x64xf32> to vector<32x16xf32>
      %80 = arith.truncf %79 : vector<32x16xf32> to vector<32x16xbf16>
      %c2_50 = arith.constant 2 : index
      %81 = arith.index_cast %1 : i32 to index
      %c0_51 = arith.constant 0 : index
      %82 = vector.load %arg13[%c2_50, %81, %c0_51] : memref<4x64x16xbf16, #tpu.memory_space<vmem>>, vector<1x32x16xbf16>
      %83 = vector.shape_cast %82 : vector<1x32x16xbf16> to vector<32x16xbf16>
      %84 = vector.shape_cast %80 : vector<32x16xbf16> to vector<1x32x16xbf16>
      tpu.vector_store %arg13[%c2_50, %81, %c0_51], %84 {strides = array<i32>} : memref<4x64x16xbf16, #tpu.memory_space<vmem>>, vector<1x32x16xbf16>,
      %85 = vector.extract_strided_slice %43 {offsets = [0, 48], sizes = [32, 16], strides = [1, 1]} : vector<32x64xf32> to vector<32x16xf32>
      %86 = arith.truncf %85 : vector<32x16xf32> to vector<32x16xbf16>
      %c3 = arith.constant 3 : index
      %87 = arith.index_cast %1 : i32 to index
      %c0_52 = arith.constant 0 : index
      %88 = vector.load %arg12[%c3, %87, %c0_52] : memref<4x64x16xbf16, #tpu.memory_space<vmem>>, vector<1x32x16xbf16>
      %89 = vector.shape_cast %88 : vector<1x32x16xbf16> to vector<32x16xbf16>
      %90 = vector.shape_cast %86 : vector<32x16xbf16> to vector<1x32x16xbf16>
      tpu.vector_store %arg12[%c3, %87, %c0_52], %90 {strides = array<i32>} : memref<4x64x16xbf16, #tpu.memory_space<vmem>>, vector<1x32x16xbf16>,
      %91 = vector.extract_strided_slice %48 {offsets = [0, 48], sizes = [32, 16], strides = [1, 1]} : vector<32x64xf32> to vector<32x16xf32>
      %92 = arith.truncf %91 : vector<32x16xf32> to vector<32x16xbf16>
      %c3_53 = arith.constant 3 : index
      %93 = arith.index_cast %1 : i32 to index
      %c0_54 = arith.constant 0 : index
      %94 = vector.load %arg13[%c3_53, %93, %c0_54] : memref<4x64x16xbf16, #tpu.memory_space<vmem>>, vector<1x32x16xbf16>
      %95 = vector.shape_cast %94 : vector<1x32x16xbf16> to vector<32x16xbf16>
      %96 = vector.shape_cast %92 : vector<32x16xbf16> to vector<1x32x16xbf16>
      tpu.vector_store %arg13[%c3_53, %93, %c0_54], %96 {strides = array<i32>} : memref<4x64x16xbf16, #tpu.memory_space<vmem>>, vector<1x32x16xbf16>,
    } else {
    }
    %c0_i32_1 = arith.constant 0 : i32
    %5 = arith.cmpi eq, %arg2, %c0_i32_1 : i32
    %6 = arith.extui %5 : i1 to i32
    %c0_i32_2 = arith.constant 0 : i32
    %7 = arith.cmpi ne, %6, %c0_i32_2 : i32
    scf.if %7 {
      %c0_30 = arith.constant 0 : index
      %c0_31 = arith.constant 0 : index
      %c0_32 = arith.constant 0 : index
      %40 = vector.load %arg3[%c0_30, %c0_31, %c0_32] : memref<1x32x32xbf16, #tpu.memory_space<vmem>>, vector<1x32x32xbf16>
      %41 = vector.shape_cast %40 : vector<1x32x32xbf16> to vector<32x32xbf16>
      %c0_33 = arith.constant 0 : index
      %c0_34 = arith.constant 0 : index
      %42 = vector.load %arg5[%c0_33, %c0_34] : memref<32x64xbf16, #tpu.memory_space<vmem>>, vector<32x64xbf16>
      %cst_35 = arith.constant dense<0.000000e+00> : vector<32x64xf32>
      %43 = tpu.matmul %41, %42, %cst_35 {dimension_numbers = #tpu.dot_dimension_numbers<[1], [0], [0], [1], [0, 0, 1, 1], [], []>} : vector<32x32xbf16>, vector<32x64xbf16>, vector<32x64xf32> -> vector<32x64xf32>
      %c0_36 = arith.constant 0 : index
      %c0_37 = arith.constant 0 : index
      %44 = vector.load %arg6[%c0_36, %c0_37] : memref<1x64xf32, #tpu.memory_space<vmem>>, vector<1x64xf32>
      %45 = vector.broadcast %44 : vector<1x64xf32> to vector<32x64xf32>
      %46 = arith.addf %43, %45 : vector<32x64xf32>
      %cst_38 = arith.constant 2.500000e-01 : f32
      %47 = vector.broadcast %cst_38 : f32 to vector<32x64xf32>
      %48 = arith.mulf %46, %47 : vector<32x64xf32>
      %49 = vector.extract_strided_slice %48 {offsets = [0, 0], sizes = [32, 16], strides = [1, 1]} : vector<32x64xf32> to vector<32x16xf32>
      %50 = arith.truncf %49 : vector<32x16xf32> to vector<32x16xbf16>
      %c0_39 = arith.constant 0 : index
      %c0_40 = arith.constant 0 : index
      %c0_41 = arith.constant 0 : index
      %51 = vector.load %arg11[%c0_39, %c0_40, %c0_41] : memref<4x32x16xbf16, #tpu.memory_space<vmem>>, vector<1x32x16xbf16>
      %52 = vector.shape_cast %51 : vector<1x32x16xbf16> to vector<32x16xbf16>
      %53 = vector.shape_cast %50 : vector<32x16xbf16> to vector<1x32x16xbf16>
      tpu.vector_store %arg11[%c0_39, %c0_40, %c0_41], %53 {strides = array<i32>} : memref<4x32x16xbf16, #tpu.memory_space<vmem>>, vector<1x32x16xbf16>,
      %54 = vector.extract_strided_slice %48 {offsets = [0, 16], sizes = [32, 16], strides = [1, 1]} : vector<32x64xf32> to vector<32x16xf32>
      %55 = arith.truncf %54 : vector<32x16xf32> to vector<32x16xbf16>
      %c1_42 = arith.constant 1 : index
      %c0_43 = arith.constant 0 : index
      %c0_44 = arith.constant 0 : index
      %56 = vector.load %arg11[%c1_42, %c0_43, %c0_44] : memref<4x32x16xbf16, #tpu.memory_space<vmem>>, vector<1x32x16xbf16>
      %57 = vector.shape_cast %56 : vector<1x32x16xbf16> to vector<32x16xbf16>
      %58 = vector.shape_cast %55 : vector<32x16xbf16> to vector<1x32x16xbf16>
      tpu.vector_store %arg11[%c1_42, %c0_43, %c0_44], %58 {strides = array<i32>} : memref<4x32x16xbf16, #tpu.memory_space<vmem>>, vector<1x32x16xbf16>,
      %59 = vector.extract_strided_slice %48 {offsets = [0, 32], sizes = [32, 16], strides = [1, 1]} : vector<32x64xf32> to vector<32x16xf32>
      %60 = arith.truncf %59 : vector<32x16xf32> to vector<32x16xbf16>
      %c2 = arith.constant 2 : index
      %c0_45 = arith.constant 0 : index
      %c0_46 = arith.constant 0 : index
      %61 = vector.load %arg11[%c2, %c0_45, %c0_46] : memref<4x32x16xbf16, #tpu.memory_space<vmem>>, vector<1x32x16xbf16>
      %62 = vector.shape_cast %61 : vector<1x32x16xbf16> to vector<32x16xbf16>
      %63 = vector.shape_cast %60 : vector<32x16xbf16> to vector<1x32x16xbf16>
      tpu.vector_store %arg11[%c2, %c0_45, %c0_46], %63 {strides = array<i32>} : memref<4x32x16xbf16, #tpu.memory_space<vmem>>, vector<1x32x16xbf16>,
      %64 = vector.extract_strided_slice %48 {offsets = [0, 48], sizes = [32, 16], strides = [1, 1]} : vector<32x64xf32> to vector<32x16xf32>
      %65 = arith.truncf %64 : vector<32x16xf32> to vector<32x16xbf16>
      %c3 = arith.constant 3 : index
      %c0_47 = arith.constant 0 : index
      %c0_48 = arith.constant 0 : index
      %66 = vector.load %arg11[%c3, %c0_47, %c0_48] : memref<4x32x16xbf16, #tpu.memory_space<vmem>>, vector<1x32x16xbf16>
      %67 = vector.shape_cast %66 : vector<1x32x16xbf16> to vector<32x16xbf16>
      %68 = vector.shape_cast %65 : vector<32x16xbf16> to vector<1x32x16xbf16>
      tpu.vector_store %arg11[%c3, %c0_47, %c0_48], %68 {strides = array<i32>} : memref<4x32x16xbf16, #tpu.memory_space<vmem>>, vector<1x32x16xbf16>,
      %cst_49 = arith.constant 0xFF800000 : f32
      %69 = vector.broadcast %cst_49 : f32 to vector<4x32x1xf32>
      %c0_50 = arith.constant 0 : index
      %c0_51 = arith.constant 0 : index
      %c0_52 = arith.constant 0 : index
      %70 = vector.load %arg14[%c0_50, %c0_51, %c0_52] : memref<4x32x2xf32, #tpu.memory_space<vmem>>, vector<4x32x1xf32>
      tpu.vector_store %arg14[%c0_50, %c0_51, %c0_52], %69 {strides = array<i32>} : memref<4x32x2xf32, #tpu.memory_space<vmem>>, vector<4x32x1xf32>,
      %cst_53 = arith.constant 0.000000e+00 : f32
      %71 = vector.broadcast %cst_53 : f32 to vector<4x32x1xf32>
      %c0_54 = arith.constant 0 : index
      %c0_55 = arith.constant 0 : index
      %c1_56 = arith.constant 1 : index
      %72 = vector.load %arg14[%c0_54, %c0_55, %c1_56] : memref<4x32x2xf32, #tpu.memory_space<vmem>>, vector<4x32x1xf32>
      tpu.vector_store %arg14[%c0_54, %c0_55, %c1_56], %71 {strides = array<i32>} : memref<4x32x2xf32, #tpu.memory_space<vmem>>, vector<4x32x1xf32>,
      %cst_57 = arith.constant 0.000000e+00 : f32
      %73 = vector.broadcast %cst_57 : f32 to vector<4x32x16xf32>
      %c0_58 = arith.constant 0 : index
      %c0_59 = arith.constant 0 : index
      %c0_60 = arith.constant 0 : index
      %74 = vector.load %arg15[%c0_58, %c0_59, %c0_60] : memref<4x32x16xf32, #tpu.memory_space<vmem>>, vector<4x32x16xf32>
      tpu.vector_store %arg15[%c0_58, %c0_59, %c0_60], %73 {strides = array<i32>} : memref<4x32x16xf32, #tpu.memory_space<vmem>>, vector<4x32x16xf32>,
    } else {
    }
    %c0 = arith.constant 0 : index
    %c0_3 = arith.constant 0 : index
    %c0_4 = arith.constant 0 : index
    %8 = vector.load %arg11[%c0, %c0_3, %c0_4] : memref<4x32x16xbf16, #tpu.memory_space<vmem>>, vector<4x32x16xbf16>
    %c0_5 = arith.constant 0 : index
    %9 = arith.index_cast %1 : i32 to index
    %c0_6 = arith.constant 0 : index
    %10 = vector.load %arg12[%c0_5, %9, %c0_6] : memref<4x64x16xbf16, #tpu.memory_space<vmem>>, vector<4x32x16xbf16>
    %c0_7 = arith.constant 0 : index
    %11 = arith.index_cast %1 : i32 to index
    %c0_8 = arith.constant 0 : index
    %12 = vector.load %arg13[%c0_7, %11, %c0_8] : memref<4x64x16xbf16, #tpu.memory_space<vmem>>, vector<4x32x16xbf16>
    "tpu.trace_start"() <{level = 10 : i32, message = "hqd,hkd->hqk"}> : () -> ()
    %cst = arith.constant dense<0.000000e+00> : vector<4x32x32xf32>
    %13 = tpu.matmul %8, %10, %cst {dimension_numbers = #tpu.dot_dimension_numbers<[2], [2], [1], [1], [0, 0, 0, 1, 1, 1], [0], [0]>} : vector<4x32x16xbf16>, vector<4x32x16xbf16>, vector<4x32x32xf32> -> vector<4x32x32xf32>
    "tpu.trace_stop"() : () -> ()
    %c0_9 = arith.constant 0 : index
    %c0_10 = arith.constant 0 : index
    %c0_11 = arith.constant 0 : index
    %14 = vector.load %arg14[%c0_9, %c0_10, %c0_11] : memref<4x32x2xf32, #tpu.memory_space<vmem>>, vector<4x32x1xf32>
    %c0_12 = arith.constant 0 : index
    %c0_13 = arith.constant 0 : index
    %c1 = arith.constant 1 : index
    %15 = vector.load %arg14[%c0_12, %c0_13, %c1] : memref<4x32x2xf32, #tpu.memory_space<vmem>>, vector<4x32x1xf32>
    %cst_14 = arith.constant dense<0xFF800000> : vector<4x32xf32>
    %16 = vector.multi_reduction <maximumf>, %13, %cst_14 [2] : vector<4x32x32xf32> to vector<4x32xf32>
    %17 = vector.shape_cast %16 : vector<4x32xf32> to vector<4x32x1xf32>
    %18 = arith.maximumf %14, %17 : vector<4x32x1xf32>
    %19 = arith.subf %14, %18 : vector<4x32x1xf32>
    %20 = math.exp %19 : vector<4x32x1xf32>
    %21 = vector.broadcast %18 : vector<4x32x1xf32> to vector<4x32x32xf32>
    %22 = arith.subf %13, %21 : vector<4x32x32xf32>
    %23 = math.exp %22 : vector<4x32x32xf32>
    %c0_15 = arith.constant 0 : index
    %c0_16 = arith.constant 0 : index
    %c0_17 = arith.constant 0 : index
    %24 = vector.load %arg14[%c0_15, %c0_16, %c0_17] : memref<4x32x2xf32, #tpu.memory_space<vmem>>, vector<4x32x1xf32>
    tpu.vector_store %arg14[%c0_15, %c0_16, %c0_17], %18 {strides = array<i32>} : memref<4x32x2xf32, #tpu.memory_space<vmem>>, vector<4x32x1xf32>,
    %25 = arith.mulf %20, %15 : vector<4x32x1xf32>
    %cst_18 = arith.constant dense<0.000000e+00> : vector<4x32xf32>
    %26 = vector.multi_reduction <add>, %23, %cst_18 [2] : vector<4x32x32xf32> to vector<4x32xf32>
    %27 = vector.shape_cast %26 : vector<4x32xf32> to vector<4x32x1xf32>
    %28 = arith.addf %25, %27 : vector<4x32x1xf32>
    %c0_19 = arith.constant 0 : index
    %c0_20 = arith.constant 0 : index
    %c1_21 = arith.constant 1 : index
    %29 = vector.load %arg14[%c0_19, %c0_20, %c1_21] : memref<4x32x2xf32, #tpu.memory_space<vmem>>, vector<4x32x1xf32>
    tpu.vector_store %arg14[%c0_19, %c0_20, %c1_21], %28 {strides = array<i32>} : memref<4x32x2xf32, #tpu.memory_space<vmem>>, vector<4x32x1xf32>,
    %c0_22 = arith.constant 0 : index
    %c0_23 = arith.constant 0 : index
    %c0_24 = arith.constant 0 : index
    %30 = vector.load %arg15[%c0_22, %c0_23, %c0_24] : memref<4x32x16xf32, #tpu.memory_space<vmem>>, vector<4x32x16xf32>
    %31 = vector.broadcast %20 : vector<4x32x1xf32> to vector<4x32x16xf32>
    %32 = arith.mulf %31, %30 : vector<4x32x16xf32>
    %33 = arith.truncf %23 : vector<4x32x32xf32> to vector<4x32x32xbf16>
    "tpu.trace_start"() <{level = 10 : i32, message = "hqk,hkd->hqd"}> : () -> ()
    %cst_25 = arith.constant dense<0.000000e+00> : vector<4x32x16xf32>
    %34 = tpu.matmul %33, %12, %cst_25 {dimension_numbers = #tpu.dot_dimension_numbers<[2], [1], [1], [2], [0, 0, 0, 1, 1, 2], [0], [0]>} : vector<4x32x32xbf16>, vector<4x32x16xbf16>, vector<4x32x16xf32> -> vector<4x32x16xf32>
    "tpu.trace_stop"() : () -> ()
    %35 = arith.addf %32, %34 : vector<4x32x16xf32>
    %c0_26 = arith.constant 0 : index
    %c0_27 = arith.constant 0 : index
    %c0_28 = arith.constant 0 : index
    %36 = vector.load %arg15[%c0_26, %c0_27, %c0_28] : memref<4x32x16xf32, #tpu.memory_space<vmem>>, vector<4x32x16xf32>
    tpu.vector_store %arg15[%c0_26, %c0_27, %c0_28], %35 {strides = array<i32>} : memref<4x32x16xf32, #tpu.memory_space<vmem>>, vector<4x32x16xf32>,
    %c1_i32 = arith.constant 1 : i32
    %37 = arith.cmpi eq, %arg2, %c1_i32 : i32
    %38 = arith.extui %37 : i1 to i32
    %c0_i32_29 = arith.constant 0 : i32
    %39 = arith.cmpi ne, %38, %c0_i32_29 : i32
    scf.if %39 {
      %c0_30 = arith.constant 0 : index
      %c0_31 = arith.constant 0 : index
      %c1_32 = arith.constant 1 : index
      %40 = vector.load %arg14[%c0_30, %c0_31, %c1_32] : memref<4x32x2xf32, #tpu.memory_space<vmem>>, vector<4x32x1xf32>
      %41 = tpu.reciprocal %40 {approx = true} : vector<4x32x1xf32> -> vector<4x32x1xf32>
      %c0_33 = arith.constant 0 : index
      %c0_34 = arith.constant 0 : index
      %c0_35 = arith.constant 0 : index
      %42 = vector.load %arg15[%c0_33, %c0_34, %c0_35] : memref<4x32x16xf32, #tpu.memory_space<vmem>>, vector<4x32x16xf32>
      %43 = vector.broadcast %41 : vector<4x32x1xf32> to vector<4x32x16xf32>
      %44 = arith.mulf %42, %43 : vector<4x32x16xf32>
      %45 = vector.extract_strided_slice %44 {offsets = [0, 0, 0], sizes = [1, 32, 16], strides = [1, 1, 1]} : vector<4x32x16xf32> to vector<1x32x16xf32>
      %46 = vector.shape_cast %45 : vector<1x32x16xf32> to vector<32x16xf32>
      %c0_36 = arith.constant 0 : index
      %c0_37 = arith.constant 0 : index
      %c0_38 = arith.constant 0 : index
      %47 = vector.load %arg10[%c0_36, %c0_37, %c0_38] : memref<1x32x64xf32, #tpu.memory_space<vmem>>, vector<1x32x16xf32>
      %48 = vector.shape_cast %47 : vector<1x32x16xf32> to vector<32x16xf32>
      %49 = vector.shape_cast %46 : vector<32x16xf32> to vector<1x32x16xf32>
      tpu.vector_store %arg10[%c0_36, %c0_37, %c0_38], %49 {strides = array<i32>} : memref<1x32x64xf32, #tpu.memory_space<vmem>>, vector<1x32x16xf32>,
      %50 = vector.extract_strided_slice %44 {offsets = [1, 0, 0], sizes = [1, 32, 16], strides = [1, 1, 1]} : vector<4x32x16xf32> to vector<1x32x16xf32>
      %51 = vector.shape_cast %50 : vector<1x32x16xf32> to vector<32x16xf32>
      %c0_39 = arith.constant 0 : index
      %c0_40 = arith.constant 0 : index
      %c16 = arith.constant 16 : index
      %52 = vector.load %arg10[%c0_39, %c0_40, %c16] : memref<1x32x64xf32, #tpu.memory_space<vmem>>, vector<1x32x16xf32>
      %53 = vector.shape_cast %52 : vector<1x32x16xf32> to vector<32x16xf32>
      %54 = vector.shape_cast %51 : vector<32x16xf32> to vector<1x32x16xf32>
      tpu.vector_store %arg10[%c0_39, %c0_40, %c16], %54 {strides = array<i32>} : memref<1x32x64xf32, #tpu.memory_space<vmem>>, vector<1x32x16xf32>,
      %55 = vector.extract_strided_slice %44 {offsets = [2, 0, 0], sizes = [1, 32, 16], strides = [1, 1, 1]} : vector<4x32x16xf32> to vector<1x32x16xf32>
      %56 = vector.shape_cast %55 : vector<1x32x16xf32> to vector<32x16xf32>
      %c0_41 = arith.constant 0 : index
      %c0_42 = arith.constant 0 : index
      %c32 = arith.constant 32 : index
      %57 = vector.load %arg10[%c0_41, %c0_42, %c32] : memref<1x32x64xf32, #tpu.memory_space<vmem>>, vector<1x32x16xf32>
      %58 = vector.shape_cast %57 : vector<1x32x16xf32> to vector<32x16xf32>
      %59 = vector.shape_cast %56 : vector<32x16xf32> to vector<1x32x16xf32>
      tpu.vector_store %arg10[%c0_41, %c0_42, %c32], %59 {strides = array<i32>} : memref<1x32x64xf32, #tpu.memory_space<vmem>>, vector<1x32x16xf32>,
      %60 = vector.extract_strided_slice %44 {offsets = [3, 0, 0], sizes = [1, 32, 16], strides = [1, 1, 1]} : vector<4x32x16xf32> to vector<1x32x16xf32>
      %61 = vector.shape_cast %60 : vector<1x32x16xf32> to vector<32x16xf32>
      %c0_43 = arith.constant 0 : index
      %c0_44 = arith.constant 0 : index
      %c48 = arith.constant 48 : index
      %62 = vector.load %arg10[%c0_43, %c0_44, %c48] : memref<1x32x64xf32, #tpu.memory_space<vmem>>, vector<1x32x16xf32>
      %63 = vector.shape_cast %62 : vector<1x32x16xf32> to vector<32x16xf32>
      %64 = vector.shape_cast %61 : vector<32x16xf32> to vector<1x32x16xf32>
      tpu.vector_store %arg10[%c0_43, %c0_44, %c48], %64 {strides = array<i32>} : memref<1x32x64xf32, #tpu.memory_space<vmem>>, vector<1x32x16xf32>,
    } else {
    }
    return
  }
  func.func @transform_0(%arg0: i32, %arg1: i32, %arg2: i32) -> (i32, i32, i32) {
    %c0_i32 = arith.constant 0 : i32
    %c0_i32_0 = arith.constant 0 : i32
    return %arg0, %arg1, %c0_i32 : i32, i32, i32
  }
  func.func @transform_1(%arg0: i32, %arg1: i32, %arg2: i32) -> (i32, i32, i32) {
    %c0_i32 = arith.constant 0 : i32
    %0 = arith.cmpi eq, %arg1, %c0_i32 : i32
    %c0_i32_0 = arith.constant 0 : i32
    %1 = arith.select %0, %arg2, %c0_i32_0 : i32
    %c0_i32_1 = arith.constant 0 : i32
    %c0_i32_2 = arith.constant 0 : i32
    return %arg0, %1, %c0_i32_1 : i32, i32, i32
  }
  func.func @transform_2(%arg0: i32, %arg1: i32, %arg2: i32) -> (i32, i32) {
    %c0_i32 = arith.constant 0 : i32
    %c0_i32_0 = arith.constant 0 : i32
    %c0_i32_1 = arith.constant 0 : i32
    return %c0_i32, %c0_i32_0 : i32, i32
  }
  func.func @transform_3(%arg0: i32, %arg1: i32, %arg2: i32) -> (i32, i32) {
    %c0_i32 = arith.constant 0 : i32
    %c0_i32_0 = arith.constant 0 : i32
    %c0_i32_1 = arith.constant 0 : i32
    return %c0_i32, %c0_i32_0 : i32, i32
  }
  func.func @transform_4(%arg0: i32, %arg1: i32, %arg2: i32) -> (i32, i32) {
    %c0_i32 = arith.constant 0 : i32
    %c0_i32_0 = arith.constant 0 : i32
    %c0_i32_1 = arith.constant 0 : i32
    return %c0_i32, %c0_i32_0 : i32, i32
  }
  func.func @transform_5(%arg0: i32, %arg1: i32, %arg2: i32) -> (i32, i32) {
    %c0_i32 = arith.constant 0 : i32
    %c0_i32_0 = arith.constant 0 : i32
    %c0_i32_1 = arith.constant 0 : i32
    return %c0_i32, %c0_i32_0 : i32, i32
  }
  func.func @transform_6(%arg0: i32, %arg1: i32, %arg2: i32) -> (i32, i32) {
    %c0_i32 = arith.constant 0 : i32
    %c0_i32_0 = arith.constant 0 : i32
    %c0_i32_1 = arith.constant 0 : i32
    return %c0_i32, %c0_i32_0 : i32, i32
  }
  func.func @transform_7(%arg0: i32, %arg1: i32, %arg2: i32) -> (i32, i32, i32) {
    %c0_i32 = arith.constant 0 : i32
    %c0_i32_0 = arith.constant 0 : i32
    return %arg0, %arg1, %c0_i32 : i32, i32, i32
  }
}

</mosaic_0001>

<bundles_post_ra>
// kernel: tpu_custom_call.1
= control target key start
LH: loop header
LB: loop body
LE: loop exit
PB: predicated region body
PF: predicated region fallthrough
CT: control target
= control target key end

     0   :  { %12 = vsyncpa [#allocation8], 0  ;;  %s3777_s0 = inlined_call_operand.vmem [shape: bf16[2,64,32], index: 0, kind: input, shape index: {}]   ;;  %s3778_s1 = inlined_call_operand.vmem [shape: bf16[2,64,32], index: 1, kind: input, shape index: {}]   ;;  %s3779_s2 = inlined_call_operand.vmem [shape: bf16[32,64], index: 2, kind: input, shape index: {}]   ;;  %s3780_s3 = inlined_call_operand.vmem [shape: f32[1,64], index: 3, kind: input, shape index: {}]   ;;  %s3781_s4 = inlined_call_operand.vmem [shape: bf16[32,64], index: 4, kind: input, shape index: {}]   ;;  %s3782_s5 = inlined_call_operand.vmem [shape: bf16[32,64], index: 5, kind: input, shape index: {}]   ;;  %s3783_s6 = inlined_call_operand.vmem [shape: f32[1,64], index: 6, kind: input, shape index: {}]   ;;  %s3784_s7 = inlined_call_operand.hbm [shape: f32[2,64,64], index: 7, kind: output, shape index: {}]  }
   0x1   :  { %14 = vsyncpa [#allocation8 + $0x1], 0  ;;  %s2907_s24 = smov 0   ;;  %s2909_s25 = smov 0  }
   0x2   :  { %s2911_s26 = smov 0   ;;  %s2913_s27 = smov 0  }
   0x3   :  { %s2915_s28 = smov 0   ;;  %s2917_s29 = smov 0  }
   0x4   :  { %s2919_s30 = smov 0   ;;  %s2921_s8 = smov 0  }
   0x5   :  { %s2923_s9 = smov 0   ;;  %s2925_s10 = smov 0  }
   0x6 LB: > { %3796 = sst [smem:[#allocation10_spill]] %s2811_s24  ;;  %s2305_s11 = sadd.s32 4294967295, %s2847_s10   ;;  %s2847_s10 = sphi %s2925_s10, %s20_s10   ;;  %s2843_s9 = sphi %s2923_s9, %s3820_s9   ;;  %s2839_s8 = sphi %s2921_s8, %s3819_s8   ;;  %s2835_s30 = sphi %s2919_s30, %s3818_s30   ;;  %s2831_s29 = sphi %s2917_s29, %s3817_s29   ;;  %s2827_s28 = sphi %s2915_s28, %s3816_s28   ;;  %s2823_s27 = sphi %s2913_s27, %s3815_s27   ;;  %s2819_s26 = sphi %s2911_s26, %s3814_s26   ;;  %s2815_s25 = sphi %s2909_s25, %s3822_s25   ;;  %s2811_s24 = sphi %s2907_s24, %s3821_s24  }
   0x7   : > { %3797 = sst [smem:[#allocation11_spill]] %s2819_s26  ;;  %s2306_s12 = sadd.s32 4294967294, %s2847_s10  }
   0x8   : > { %3798 = sst [smem:[#allocation12_spill]] %s2835_s30  ;;  %s32_s13 = sadd.s32 1, %s2835_s30 }
   0x9   : > { %3799 = sst [smem:[#allocation13_spill]] %s2839_s8  ;;  %p33_p0 = scmp.ge.s32.totalorder %s32_s13, 2 }
   0xa   : > { %3800 = sst [smem:[#allocation14_spill]] %s2843_s9  ;;  %s35_s14 = sadd.s32 1, %s2839_s8 }
   0xb   : > { %3801 = sst [smem:[#allocation15_spill]] %s2847_s10  ;;  %s39_s15 = sadd.s32 1, %s2843_s9 }
   0xc   : > { %p223_p1 = scmp.ne.s32.totalorder %s2819_s26, %s2815_s25  ;;  %s3824_s13 = smov (%p33_p0, %s32_s13), 0 }
   0xd   : > { %3802 = sst [smem:[#allocation16_spill]] %s3824_s13  ;;  %s3826_s14 = smov (!%p33_p0, %s35_s14), %s2839_s8 }
   0xe   : > { %p224_p2 = scmp.eq.s32.totalorder %s2305_s11, 7  ;;  %p229_p3 = scmp.ne.s32.totalorder %s2815_s25, %s2811_s24 }
   0xf   : > { %p37_p4 = scmp.ge.s32.totalorder %s3826_s14, 2  ;;  %p230_p5 = scmp.eq.s32.totalorder %s2306_s12, 7 }
  0x10   : > { %p2969_p6 = por %p224_p2, %p223_p1  ;;  %p2309_p8 = scmp.ge.s32.totalorder %s2847_s10, 1 }
  0x11   : > { %s3828_s14 = smov (%p37_p4, %s3826_s14), 0  ;;  %s3830_s15 = smov (!%p37_p4, %s39_s15), %s2843_s9 }
  0x12   : > { %3804 = sst [smem:[#allocation17_spill]] %s3828_s14  ;;  %p2976_p7 = por %p230_p5, %p229_p3 }
  0x13   : > { %p41_p9 = scmp.ge.s32.totalorder %s3830_s15, 2  ;;  %p293_p10 = scmp.lt.s32.totalorder %s2847_s10, 9 }
  0x14   : > { %s3805_s17 = scalar_select %p2976_p7, 1, 0 }
  0x15   : > { %s209_s18 = ssub.s32 %s2839_s8, %s3828_s14  ;;  %s3832_s15 = smov (%p41_p9, %s3830_s15), 0 }
  0x16   : > { %3806 = sst [smem:[#allocation18_spill]] %s3805_s17  ;;  %p294_p11 = pnand %p2309_p8, %p293_p10 }
  0x17   : > { %3807 = sst [smem:[#allocation19_spill]] %s3832_s15  ;;  %s208_s19 = ssub.s32 %s2843_s9, %s3832_s15 }
  0x18   : > { %s210_s20 = sor.u32 %s209_s18, %s208_s19  ;;  %s213_s21 = sadd.s32 1, %s2819_s26 }
  0x19   : > { %p211_p12 = scmp.eq.s32.totalorder %s210_s20, 0  ;;  %297 = sbr.rel (%p294_p11) target bundleno = 1883 (0x75b), region = 48 }
  0x1a   : > { %s3791_s23 = sand.u32 (!%p294_p11), 1, %s2815_s25   ;;  %s2994_s11 = sshll.u32 (!%p294_p11), %s2827_s28, 2 }
  0x1b   : > { %s2990_s22 = scalar_select %p211_p12, %s2819_s26, %s213_s21  }
  0x1c   : > { %s2310_s12 = sshll.u32 (!%p294_p11), %s3791_s23, 5  ;;  %p341_p13 = scmp.lt.s32.totalorder (!%p294_p11), %s2831_s29, 1 }
  0x1d   : > { %3808 = sst [smem:[#allocation20_spill]] %s2990_s22  ;;  %p343_p0 = scmp.lt.s32.totalorder (!%p294_p11), %s2994_s11, 7 }
  0x1e   : > { %p350_p1 = scmp.eq.s32.totalorder (!%p294_p11), %s2827_s28, 0  ;;  %s2317_s15 = sshll.u32 (!%p294_p11), %s2823_s27, 5 }
  0x1f   : > { %p2318_p3 = scmp.ne.s32.totalorder (!%p294_p11), %s2827_s28, 0 }
  0x20   : > { %s342_s18 = scalar_select %p341_p13, %s2831_s29, 1 }
  0x21   : > { %s344_s19 = scalar_select %p343_p0, %s2994_s11, 7 }
  0x22   : > { %s2312_s20 = sshll.u32 %s342_s18, 3  ;;  %s3013_s18 = scalar_lea.vmem [#allocation7], %s2310_s12  ;;  %v2627_v0 = vld [vmem:[%s3781_s4] sm:$0xff] (!%p2318_p3)   ;;  %v2629_v2 = vld [vmem:[%s3781_s4 + $0x8] sm:$0xff] (!%p2318_p3)   ;;  %vm401_vm0 = vcmask (!%p2318_p3), 261120   ;;  %vm535_vm1 = vcmask (!%p2318_p3), 130048  }
  0x23   : > { %s346_s21 = sadd.s32 %s2312_s20, %s344_s19  ;;  %v2628_v1 = vld [vmem:[%s3782_s5] sm:$0xff] (!%p2318_p3)   ;;  %2427 = vmatprep.subr.bf16.mxu0 (!%p2318_p3), %v2627_v0  ;;  %v2631_v4 = vld [vmem:[%s3782_s5 + $0x8] sm:$0xff] (!%p2318_p3)   ;;  %s2849_s12 = smov (!%p2318_p3), 96  }
  0x24   : > { %s2313_s14 = sshll.u32 %s346_s21, 2  ;;  %2428 = vmatpush3.bf16.msra.mxu0 (!%p2318_p3), %v2627_v0  ;;  %2435 = vmatprep.subr.bf16.mxu1 (!%p2318_p3), %v2628_v1  ;;  %v2325_v6 = vld [vmem:[%s3783_s6] ss:$0 sm:$0xff] (!%p2318_p3)  ;;  %s2851_s21 = smov (!%p2318_p3), 80  }
  0x25   : > { %s3007_s8 = scalar_lea.vmem %s3777_s0, %s2313_s14  ;;  %2429 = vmatprep.subr.bf16.mxu0 (!%p2318_p3), %v2629_v2  ;;  %2436 = vmatpush3.bf16.msra.mxu1 (!%p2318_p3), %v2628_v1  ;;  %s531_s14 = sshra.s32 (!%p2318_p3), %s2317_s15, 4 }
  0x26   : > { %s351_s30 = scalar_select %p350_p1, %s2823_s27, 0 }
  0x27   : > { %2437 = vmatprep.subr.bf16.mxu1 (!%p2318_p3), %v2631_v4  ;;  %s2330_s17 = sshll.u32 (!%p2318_p3), %s531_s14, 3 }
  0x28   : > { %s2314_s22 = sshll.u32 %s351_s30, 2  ;;  %370 = sbr.rel (%p2318_p3) target bundleno = 401 (0x191), region = 52  ;;  %2430 = vmatpush3.bf16.msra.mxu0 (!%p2318_p3), %v2629_v2 }
  0x29   : > { %p355_p2 = scmp.lt.s32.totalorder %s2314_s22, 7  ;;  %2438 = vmatpush3.bf16.msra.mxu1 (!%p2318_p3), %v2631_v4  ;;  %s3039_s19 = scalar_lea.vmem (!%p2318_p3), [#allocation4], %s2330_s17 }
  0x2b   : > { %s3834_s22 = smov (!%p355_p2, %s2314_s22), 7 }
  0x2c   : > { %s358_s26 = sadd.s32 %s2312_s20, %s3834_s22  ;;  %s2850_s20 = smov (!%p2318_p3), 112  }
  0x2d   : > { %s2316_s23 = sshll.u32 %s358_s26, 2 }
  0x2e   : > { %s360_s10 = scalar_lea.vmem %s3778_s1, %s2316_s23 }
  0x2f   : > { %v2630_v3 = vld [vmem:[%s360_s10] sm:$0xff]   ;;  %v2632_v5 = vld [vmem:[%s360_s10 + $0x8] sm:$0xff]   ;;  %s3033_s10 = scalar_lea.vmem [#allocation3], %s2330_s17 }
  0x30   : > { %2431 = vmatprep.mubr.msk.bf16.mxu0 %vm401_vm0, %v2630_v3  ;;  %2439 = vmatprep.mubr.msk.bf16.mxu1 %vm401_vm0, %v2630_v3 }
  0x31   : > { %2432 = vmatmul.mubr.msk.bf16.vlgmr.msra.gmra.mrb[0].mxu0 %vm401_vm0, %v2632_v5  ;;  %2440 = vmatmul.mubr.msk.bf16.vlgmr.msra.gmra.mrb[0].mxu1 %vm401_vm0, %v2632_v5 }
 0x104   : > { %v2433_v7 = vpop.f32.mrb[0].mxu0  ;;  %v2441_v9 = vpop.f32.mrb[0].mxu1 }
 0x105   : > { %v442_v8 = vpop.f32.mrb[1].mxu0  ;;  %v523_v11 = vadd.f32 %v2441_v9, %v2325_v6  ;;  %v514_v12 = vpop.f32.mrb[1].mxu1 }
 0x106   : > { %v2434_v10 = vpop.f32.mrb[2].mxu0  ;;  %v515_v15 = vadd.f32 %v2325_v6, %v514_v12  ;;  %v2442_v16 = vpop.f32.mrb[2].mxu1 }
 0x107   : > { %v530_v13 = vpack.c.bf16 %v2434_v10, %v2433_v7  ;;  %v445_v14 = vpop.f32.mrb[3].mxu0  ;;  %v526_v18 = vadd.f32 %v2442_v16, %v2325_v6  ;;  %v517_v19 = vpop.f32.mrb[3].mxu1 }
 0x108   : > { %v529_v17 = vpack.c.bf16 %v445_v14, %v442_v8  ;;  %v518_v20 = vadd.f32 %v2325_v6, %v517_v19 }
 0x109   : > { %537 = vst.msk [vmem:[%s3033_s10 + $0x8] sm:$0xff] %vm535_vm1, %v530_v13  ;;  %571 = vrot.lane.b32.xlu1 %v530_v13, %s2849_s12  ;;  %548 = vrot.lane.b32.xlu0 %v530_v13, %s2850_s20  ;;  %v539_v21 = vpack.c.bf16 %v526_v18, %v523_v11 }
 0x10a   : > { %536 = vst.msk [vmem:[%s3033_s10] sm:$0xff] %vm535_vm1, %v529_v17  ;;  %v538_v22 = vpack.c.bf16 %v518_v20, %v515_v15 }
 0x10b   : > { %543 = vst.msk [vmem:[%s3039_s19 + $0x8] sm:$0xff] %vm535_vm1, %v539_v21 }
 0x10c   : > { %542 = vst.msk [vmem:[%s3039_s19] sm:$0xff] %vm535_vm1, %v538_v22 }
 0x10d   : > { %592 = vrot.lane.b32.xlu1 %v530_v13, %s2851_s21  ;;  %546 = vrot.lane.b32.xlu0 %v529_v17, %s2850_s20 }
 0x111   : > { %561 = vrot.lane.b32.xlu1 %v539_v21, %s2850_s20  ;;  %569 = vrot.lane.b32.xlu0 %v529_v17, %s2849_s12 }
 0x115   : > { %582 = vrot.lane.b32.xlu1 %v539_v21, %s2849_s12  ;;  %590 = vrot.lane.b32.xlu0 %v529_v17, %s2851_s21 }
 0x119   : > { %559 = vrot.lane.b32.xlu1 %v538_v22, %s2850_s20  ;;  %580 = vrot.lane.b32.xlu0 %v538_v22, %s2849_s12 }
 0x11d   : > { %603 = vrot.lane.b32.xlu1 %v539_v21, %s2851_s21  ;;  %601 = vrot.lane.b32.xlu0 %v538_v22, %s2851_s21 }
 0x17b   : > { %v572_v23 = vpop.permute.xlu1 %571  ;;  %v549_v24 = vpop.permute.xlu0 %548 }
 0x17c   : > { %2340 = vst.msk [vmem:[%s3033_s10 + $0x48] sm:$0xff] %vm535_vm1, %v572_v23  ;;  %2334 = vst.msk [vmem:[%s3033_s10 + $0x28] sm:$0xff] %vm535_vm1, %v549_v24 }
 0x17f   : > { %v593_v25 = vpop.permute.xlu1 %592  ;;  %v547_v26 = vpop.permute.xlu0 %546 }
 0x180   : > { %2346 = vst.msk [vmem:[%s3033_s10 + $0x68] sm:$0xff] %vm535_vm1, %v593_v25  ;;  %2333 = vst.msk [vmem:[%s3033_s10 + $0x20] sm:$0xff] %vm535_vm1, %v547_v26 }
 0x183   : > { %v562_v27 = vpop.permute.xlu1 %561  ;;  %v570_v28 = vpop.permute.xlu0 %569 }
 0x184   : > { %2337 = vst.msk [vmem:[%s3039_s19 + $0x28] sm:$0xff] %vm535_vm1, %v562_v27  ;;  %2339 = vst.msk [vmem:[%s3033_s10 + $0x40] sm:$0xff] %vm535_vm1, %v570_v28 }
 0x187   : > { %v583_v29 = vpop.permute.xlu1 %582  ;;  %v591_v30 = vpop.permute.xlu0 %590 }
 0x188   : > { %2343 = vst.msk [vmem:[%s3039_s19 + $0x48] sm:$0xff] %vm535_vm1, %v583_v29  ;;  %2345 = vst.msk [vmem:[%s3033_s10 + $0x60] sm:$0xff] %vm535_vm1, %v591_v30 }
 0x18b   : > { %v560_v31 = vpop.permute.xlu1 %559  ;;  %v581_v32 = vpop.permute.xlu0 %580 }
 0x18c   : > { %2336 = vst.msk [vmem:[%s3039_s19 + $0x20] sm:$0xff] %vm535_vm1, %v560_v31  ;;  %2342 = vst.msk [vmem:[%s3039_s19 + $0x40] sm:$0xff] %vm535_vm1, %v581_v32 }
 0x18f   : > { %v604_v33 = vpop.permute.xlu1 %603  ;;  %v602_v34 = vpop.permute.xlu0 %601 }
 0x190   : > { %2349 = vst.msk [vmem:[%s3039_s19 + $0x68] sm:$0xff] %vm535_vm1, %v604_v33  ;;  %2348 = vst.msk [vmem:[%s3039_s19 + $0x60] sm:$0xff] %vm535_vm1, %v602_v34 }
 0x191 PF: > { %p2350_p4 = scmp.ne.s32.totalorder %s2823_s27, 0 }
 0x192   : > { %v2633_v35 = vld [vmem:[%s3779_s2] sm:$0xff] (!%p2350_p4)   ;;  %v2634_v36 = vld [vmem:[%s3779_s2 + $0x8] sm:$0xff] (!%p2350_p4)   ;;  %vm652_vm2 = vcmask (!%p2350_p4), 261120   ;;  %vm714_vm3 = vcmask (!%p2350_p4), 130048   ;;  %vm746_vm4 = vcmask (!%p2350_p4), 7168   ;;  %vm763_vm5 = vcmask (!%p2350_p4), 15368  }
 0x193   : > { %614 = sbr.rel (%p2350_p4) target bundleno = 755 (0x2f3), region = 56  ;;  %2443 = vmatprep.subr.bf16.mxu0 (!%p2350_p4), %v2633_v35  ;;  %v2635_v37 = vld [vmem:[%s3007_s8] sm:$0xff] (!%p2350_p4)   ;;  %v2636_v38 = vld [vmem:[%s3007_s8 + $0x8] sm:$0xff] (!%p2350_p4)   ;;  %v2852_v39 = vmov (!%p2350_p4), -inf   ;;  %v2853_v40 = vmov (!%p2350_p4), 0.0   ;;  %s2854_s28 = smov (!%p2350_p4), 96  }
 0x194   : > { %2444 = vmatpush3.bf16.msra.mxu0 (!%p2350_p4), %v2633_v35  ;;  %2447 = vmatprep.mubr.msk.bf16.mxu0 (!%p2350_p4), %vm652_vm2, %v2635_v37  ;;  %747 = vst.msk [vmem:[#allocation5] sm:$0xff] (!%p2350_p4), %vm746_vm4, %v2852_v39  ;;  %748 = vst.msk [vmem:[#allocation5 + $0x8] sm:$0xff] (!%p2350_p4), %vm746_vm4, %v2852_v39  ;;  %v2351_v41 = vld [vmem:[%s3780_s3] ss:$0 sm:$0xff] (!%p2350_p4)  ;;  %s2855_s14 = smov (!%p2350_p4), 112   ;;  %s2856_s17 = smov (!%p2350_p4), 80  }
 0x195   : > { %2445 = vmatprep.subr.bf16.mxu0 (!%p2350_p4), %v2634_v36  ;;  %749 = vst.msk [vmem:[#allocation5 + $0x10] sm:$0xff] (!%p2350_p4), %vm746_vm4, %v2852_v39  ;;  %750 = vst.msk [vmem:[#allocation5 + $0x18] sm:$0xff] (!%p2350_p4), %vm746_vm4, %v2852_v39 }
 0x196   : > { %751 = vst.msk [vmem:[#allocation5 + $0x20] sm:$0xff] (!%p2350_p4), %vm746_vm4, %v2852_v39  ;;  %752 = vst.msk [vmem:[#allocation5 + $0x28] sm:$0xff] (!%p2350_p4), %vm746_vm4, %v2852_v39 }
 0x197   : > { %753 = vst.msk [vmem:[#allocation5 + $0x30] sm:$0xff] (!%p2350_p4), %vm746_vm4, %v2852_v39  ;;  %754 = vst.msk [vmem:[#allocation5 + $0x38] sm:$0xff] (!%p2350_p4), %vm746_vm4, %v2852_v39 }
 0x198   : > { %2446 = vmatpush3.bf16.msra.mxu0 (!%p2350_p4), %v2634_v36  ;;  %755 = vst.msk [vmem:[#allocation5 + $0x40] sm:$0xff] (!%p2350_p4), %vm746_vm4, %v2852_v39  ;;  %756 = vst.msk [vmem:[#allocation5 + $0x48] sm:$0xff] (!%p2350_p4), %vm746_vm4, %v2852_v39 }
 0x199   : > { %757 = vst.msk [vmem:[#allocation5 + $0x50] sm:$0xff] (!%p2350_p4), %vm746_vm4, %v2852_v39  ;;  %758 = vst.msk [vmem:[#allocation5 + $0x58] sm:$0xff] (!%p2350_p4), %vm746_vm4, %v2852_v39 }
 0x19a   : > { %759 = vst.msk [vmem:[#allocation5 + $0x60] sm:$0xff] %vm746_vm4, %v2852_v39  ;;  %760 = vst.msk [vmem:[#allocation5 + $0x68] sm:$0xff] %vm746_vm4, %v2852_v39 }
 0x19b   : > { %2448 = vmatmul.mubr.msk.bf16.vlgmr.msra.gmra.mrb[0].mxu0 %vm652_vm2, %v2636_v38  ;;  %761 = vst.msk [vmem:[#allocation5 + $0x70] sm:$0xff] %vm746_vm4, %v2852_v39  ;;  %762 = vst.msk [vmem:[#allocation5 + $0x78] sm:$0xff] %vm746_vm4, %v2852_v39 }
 0x19c   : > { %780 = vst.msk [vmem:[#allocation6] sm:$0xff] %vm714_vm3, %v2853_v40  ;;  %781 = vst.msk [vmem:[#allocation6 + $0x8] sm:$0xff] %vm714_vm3, %v2853_v40 }
 0x19d   : > { %782 = vst.msk [vmem:[#allocation6 + $0x10] sm:$0xff] %vm714_vm3, %v2853_v40  ;;  %783 = vst.msk [vmem:[#allocation6 + $0x18] sm:$0xff] %vm714_vm3, %v2853_v40 }
 0x19e   : > { %784 = vst.msk [vmem:[#allocation6 + $0x20] sm:$0xff] %vm714_vm3, %v2853_v40  ;;  %785 = vst.msk [vmem:[#allocation6 + $0x28] sm:$0xff] %vm714_vm3, %v2853_v40 }
 0x19f   : > { %786 = vst.msk [vmem:[#allocation6 + $0x30] sm:$0xff] %vm714_vm3, %v2853_v40  ;;  %787 = vst.msk [vmem:[#allocation6 + $0x38] sm:$0xff] %vm714_vm3, %v2853_v40 }
 0x1a0   : > { %788 = vst.msk [vmem:[#allocation6 + $0x40] sm:$0xff] %vm714_vm3, %v2853_v40  ;;  %789 = vst.msk [vmem:[#allocation6 + $0x48] sm:$0xff] %vm714_vm3, %v2853_v40 }
 0x1a1   : > { %790 = vst.msk [vmem:[#allocation6 + $0x50] sm:$0xff] %vm714_vm3, %v2853_v40  ;;  %791 = vst.msk [vmem:[#allocation6 + $0x58] sm:$0xff] %vm714_vm3, %v2853_v40 }
 0x1a2   : > { %792 = vst.msk [vmem:[#allocation6 + $0x60] sm:$0xff] %vm714_vm3, %v2853_v40  ;;  %793 = vst.msk [vmem:[#allocation6 + $0x68] sm:$0xff] %vm714_vm3, %v2853_v40 }
 0x1a3   : > { %794 = vst.msk [vmem:[#allocation6 + $0x70] sm:$0xff] %vm714_vm3, %v2853_v40  ;;  %795 = vst.msk [vmem:[#allocation6 + $0x78] sm:$0xff] %vm714_vm3, %v2853_v40 }
 0x1a4   : > { %764 = vst.msk [vmem:[#allocation5] sm:$0xff] %vm763_vm5, %v2853_v40  ;;  %765 = vst.msk [vmem:[#allocation5 + $0x8] sm:$0xff] %vm763_vm5, %v2853_v40 }
 0x1a5   : > { %766 = vst.msk [vmem:[#allocation5 + $0x10] sm:$0xff] %vm763_vm5, %v2853_v40  ;;  %767 = vst.msk [vmem:[#allocation5 + $0x18] sm:$0xff] %vm763_vm5, %v2853_v40 }
 0x1a6   : > { %768 = vst.msk [vmem:[#allocation5 + $0x20] sm:$0xff] %vm763_vm5, %v2853_v40  ;;  %769 = vst.msk [vmem:[#allocation5 + $0x28] sm:$0xff] %vm763_vm5, %v2853_v40 }
 0x1a7   : > { %770 = vst.msk [vmem:[#allocation5 + $0x30] sm:$0xff] %vm763_vm5, %v2853_v40  ;;  %771 = vst.msk [vmem:[#allocation5 + $0x38] sm:$0xff] %vm763_vm5, %v2853_v40 }
 0x1a8   : > { %772 = vst.msk [vmem:[#allocation5 + $0x40] sm:$0xff] %vm763_vm5, %v2853_v40  ;;  %773 = vst.msk [vmem:[#allocation5 + $0x48] sm:$0xff] %vm763_vm5, %v2853_v40 }
 0x1a9   : > { %774 = vst.msk [vmem:[#allocation5 + $0x50] sm:$0xff] %vm763_vm5, %v2853_v40  ;;  %775 = vst.msk [vmem:[#allocation5 + $0x58] sm:$0xff] %vm763_vm5, %v2853_v40 }
 0x1aa   : > { %776 = vst.msk [vmem:[#allocation5 + $0x60] sm:$0xff] %vm763_vm5, %v2853_v40  ;;  %777 = vst.msk [vmem:[#allocation5 + $0x68] sm:$0xff] %vm763_vm5, %v2853_v40 }
 0x1ab   : > { %778 = vst.msk [vmem:[#allocation5 + $0x70] sm:$0xff] %vm763_vm5, %v2853_v40  ;;  %779 = vst.msk [vmem:[#allocation5 + $0x78] sm:$0xff] %vm763_vm5, %v2853_v40 }
 0x26e   : > { %v2449_v42 = vpop.f32.mrb[0].mxu0 }
 0x26f   : > { %v702_v43 = vadd.f32 %v2449_v42, %v2351_v41  ;;  %v693_v44 = vpop.f32.mrb[1].mxu0 }
 0x270   : > { %v694_v45 = vadd.f32 %v2351_v41, %v693_v44  ;;  %v2450_v46 = vpop.f32.mrb[2].mxu0 }
 0x271   : > { %v705_v47 = vadd.f32 %v2450_v46, %v2351_v41  ;;  %v696_v48 = vpop.f32.mrb[3].mxu0  ;;  %v710_v50 = vmul.f32 0.25, %v702_v43 }
 0x272   : > { %v697_v49 = vadd.f32 %v2351_v41, %v696_v48  ;;  %v708_v52 = vmul.f32 0.25, %v694_v45 }
 0x273   : > { %v711_v51 = vmul.f32 0.25, %v705_v47 }
 0x274   : > { %v709_v53 = vmul.f32 0.25, %v697_v49 }
 0x275   : > { %v713_v54 = vpack.c.bf16 %v711_v51, %v710_v50 }
 0x276   : > { %v712_v55 = vpack.c.bf16 %v709_v53, %v708_v52 }
 0x277   : > { %716 = vst.msk [vmem:[#allocation2 + $0x8] sm:$0xff] %vm714_vm3, %v713_v54  ;;  %730 = vrot.lane.b32.xlu1 %v713_v54, %s2854_s28  ;;  %721 = vrot.lane.b32.xlu0 %v713_v54, %s2855_s14 }
 0x278   : > { %715 = vst.msk [vmem:[#allocation2] sm:$0xff] %vm714_vm3, %v712_v55 }
 0x27b   : > { %728 = vrot.lane.b32.xlu1 %v712_v55, %s2854_s28  ;;  %719 = vrot.lane.b32.xlu0 %v712_v55, %s2855_s14 }
 0x27f   : > { %739 = vrot.lane.b32.xlu1 %v713_v54, %s2856_s17  ;;  %737 = vrot.lane.b32.xlu0 %v712_v55, %s2856_s17 }
 0x2e9   : > { %v731_v56 = vpop.permute.xlu1 %730  ;;  %v722_v57 = vpop.permute.xlu0 %721 }
 0x2ea   : > { %736 = vst.msk [vmem:[#allocation2 + $0x28] sm:$0xff] %vm714_vm3, %v731_v56  ;;  %727 = vst.msk [vmem:[#allocation2 + $0x18] sm:$0xff] %vm714_vm3, %v722_v57 }
 0x2ed   : > { %v729_v58 = vpop.permute.xlu1 %728  ;;  %v720_v59 = vpop.permute.xlu0 %719 }
 0x2ee   : > { %735 = vst.msk [vmem:[#allocation2 + $0x20] sm:$0xff] %vm714_vm3, %v729_v58  ;;  %726 = vst.msk [vmem:[#allocation2 + $0x10] sm:$0xff] %vm714_vm3, %v720_v59 }
 0x2f1   : > { %v740_v60 = vpop.permute.xlu1 %739  ;;  %v738_v61 = vpop.permute.xlu0 %737 }
 0x2f2   : > { %745 = vst.msk [vmem:[#allocation2 + $0x38] sm:$0xff] %vm714_vm3, %v740_v60  ;;  %744 = vst.msk [vmem:[#allocation2 + $0x30] sm:$0xff] %vm714_vm3, %v738_v61 }
 0x2f3 PF: > { %s3139_s22 = sshra.s32 %s2317_s15, 4  ;;  %vm826_vm6 = vcmask 130048   ;;  %v796_v62 = vld [vmem:[#allocation2] sm:$0xff]  ;;  %v797_v10 = vld [vmem:[#allocation2 + $0x8] sm:$0xff]  ;;  %v799_v11 = vld [vmem:[#allocation2 + $0x18] sm:$0xff]  ;;  %vm1087_vm7 = vcmask 261120  }
 0x2f4   : > { %s2358_s23 = sshll.u32 %s3139_s22, 3  ;;  %2455 = vmatprep.mubr.msk.bf16.mxu0 %vm826_vm6, %v796_v62  ;;  %v801_v20 = vld [vmem:[#allocation2 + $0x28] sm:$0xff]  ;;  %v2857_v43 = vmov 0   ;;  %vm1328_vm8 = vcmask 7168   ;;  %s2858_s12 = smov 127   ;;  %vm1553_vm9 = vcmask 15368  }
 0x2f5   : > { %v798_v63 = vld [vmem:[#allocation2 + $0x10] sm:$0xff]  ;;  %s807_s10 = scalar_lea.vmem [#allocation3], %s2358_s23  ;;  %v800_v16 = vld [vmem:[#allocation2 + $0x20] sm:$0xff]  ;;  %2637 = vset.pattern.permute.xlu1 %v2857_v43  ;;  %2638 = vset.pattern.permute.xlu0 %v2857_v43  ;;  %s3374_s15 = scalar_lea.vmem [#allocation4], %s2358_s23 }
 0x2f6   : > { %2463 = vmatprep.mubr.msk.bf16.mxu1 %vm826_vm6, %v798_v63  ;;  %v808_v0 = vld [vmem:[%s807_s10] sm:$0xff]  ;;  %v809_v2 = vld [vmem:[%s807_s10 + $0x8] sm:$0xff]  ;;  %v3232_v55 = vld [vmem:[#allocation5 + $0x10] sm:$0xff]  ;;  %s2859_s20 = smov 1   ;;  %p2376_p5 = scmp.ne.s32.totalorder %s2823_s27, 1 }
 0x2f7   : > { %v810_v1 = vld [vmem:[%s807_s10 + $0x20] sm:$0xff]  ;;  %2515 = vmatprep.subr.msk.bf16.mxu0 %vm826_vm6, %v808_v0  ;;  %v834_v3 = vsel %vm826_vm6, %v808_v0, 0  ;;  %v811_v5 = vld [vmem:[%s807_s10 + $0x28] sm:$0xff]  ;;  %v837_v6 = vsel %vm826_vm6, %v809_v2, 0  ;;  %v3242_v61 = vld [vmem:[#allocation5 + $0x30] sm:$0xff]  ;;  %s2861_s27 = smov (!%p2376_p5), 16  }
 0x2f8   : > { %2517 = vmatprep.subr.msk.bf16.mxu1 %vm826_vm6, %v810_v1  ;;  %v895_v4 = vsel %vm826_vm6, %v810_v1, 0  ;;  %2452 = vmatpush3.bf16.xpose.msra.mxu0 %v834_v3  ;;  %v898_v7 = vsel %vm826_vm6, %v811_v5, 0  ;;  %v812_v8 = vld [vmem:[%s807_s10 + $0x40] sm:$0xff]  ;;  %v813_v14 = vld [vmem:[%s807_s10 + $0x48] sm:$0xff]  ;;  %v3247_v63 = vld [vmem:[#allocation5 + $0x18] sm:$0xff]  ;;  %s2862_s19 = smov (!%p2376_p5), 32  }
 0x2f9   : > { %2460 = vmatpush3.bf16.xpose.msra.mxu1 %v895_v4  ;;  %2516 = vmatprep.subr.msk.bf16.mxu0 %vm826_vm6, %v809_v2  ;;  %v814_v9 = vld [vmem:[%s807_s10 + $0x60] sm:$0xff]  ;;  %v956_v12 = vsel %vm826_vm6, %v812_v8, 0  ;;  %v815_v15 = vld [vmem:[%s807_s10 + $0x68] sm:$0xff]  ;;  %v802_v17 = vld [vmem:[#allocation2 + $0x30] sm:$0xff]  ;;  %v959_v18 = vsel %vm826_vm6, %v813_v14, 0  ;;  %s2863_s21 = smov (!%p2376_p5), 48  }
 0x2fa   : > { %2518 = vmatprep.subr.msk.bf16.mxu1 %vm826_vm6, %v811_v5  ;;  %v1017_v13 = vsel %vm826_vm6, %v814_v9, 0  ;;  %v1020_v19 = vsel %vm826_vm6, %v815_v15, 0  ;;  %v803_v21 = vld [vmem:[#allocation2 + $0x38] sm:$0xff]  ;;  %v3234_v56 = vld [vmem:[#allocation5 + $0x20] sm:$0xff]  ;;  %vm2110_vm10 = vcmask (!%p2376_p5), 261248   ;;  %vm2131_vm11 = vcmask (!%p2376_p5), 392448  }
 0x2fb   : > { %v3261_v5 = vld [vmem:[#allocation5] sm:$0xff]  ;;  %vm2152_vm12 = vcmask (!%p2376_p5), 523648  }
 0x2fc   : > { %v3326_v43 = vld [vmem:[#allocation5 + $0x60] sm:$0xff] }
 0x300   : > { %2454 = vmatpush3.bf16.xpose.msra.mxu0 %v837_v6 }
 0x301   : > { %2462 = vmatpush3.bf16.xpose.msra.mxu1 %v898_v7  ;;  %2519 = vmatprep.subr.msk.bf16.mxu0 %vm826_vm6, %v812_v8  ;;  %v3266_v7 = vld [vmem:[#allocation5 + $0x38] sm:$0xff] }
 0x302   : > { %2521 = vmatprep.subr.msk.bf16.mxu1 %vm826_vm6, %v814_v9 }
 0x307   : > { %2456 = vmatmul.mubr.msk.bf16.vlgmr.msra.gmra.mrb[0].mxu0 %vm826_vm6, %v797_v10 }
 0x308   : > { %2464 = vmatmul.mubr.msk.bf16.vlgmr.msra.gmra.mrb[0].mxu1 %vm826_vm6, %v799_v11  ;;  %2468 = vmatpush3.bf16.xpose.msra.mxu0 %v956_v12  ;;  %v3278_v12 = vld [vmem:[#allocation5 + $0x8] sm:$0xff] }
 0x309   : > { %2476 = vmatpush3.bf16.xpose.msra.mxu1 %v1017_v13  ;;  %2520 = vmatprep.subr.msk.bf16.mxu0 %vm826_vm6, %v813_v14  ;;  %v3282_v13 = vld [vmem:[#allocation5 + $0x28] sm:$0xff] }
 0x30a   : > { %2522 = vmatprep.subr.msk.bf16.mxu1 %vm826_vm6, %v815_v15  ;;  %2471 = vmatprep.mubr.msk.bf16.mxu0 %vm826_vm6, %v800_v16 }
 0x30b   : > { %2479 = vmatprep.mubr.msk.bf16.mxu1 %vm826_vm6, %v802_v17 }
 0x310   : > { %2470 = vmatpush3.bf16.xpose.msra.mxu0 %v959_v18  ;;  %v3294_v18 = vld [vmem:[#allocation5 + $0x50] sm:$0xff] }
 0x311   : > { %2478 = vmatpush3.bf16.xpose.msra.mxu1 %v1020_v19 }
 0x317   : > { %2472 = vmatmul.mubr.msk.bf16.vlgmr.msra.gmra.mrb[4].mxu0 %vm826_vm6, %v801_v20  ;;  %v3299_v20 = vld [vmem:[#allocation5 + $0x58] sm:$0xff] }
 0x318   : > { %2480 = vmatmul.mubr.msk.bf16.vlgmr.msra.gmra.mrb[4].mxu1 %vm826_vm6, %v803_v21 }
 0x3da   : > { %v3168_v22 = vpop.f32.mrb[0].mxu0 }
 0x3db   : > { %v3170_v23 = vpop.f32.mrb[0].mxu1  ;;  %v3172_v24 = vpop.f32.mrb[1].mxu0  ;;  %v1094_v26 = vsel %vm1087_vm7, %v3168_v22, -inf }
 0x3dc   : > { %v3174_v25 = vpop.f32.mrb[1].mxu1  ;;  %1095 = vmax.xlane.f32.xlu0 %v1094_v26  ;;  %v3178_v27 = vpop.f32.mrb[2].mxu0  ;;  %v1106_v32 = vsel %vm1087_vm7, %v3170_v23, -inf  ;;  %v1088_v34 = vsel %vm1087_vm7, %v3172_v24, -inf }
 0x3dd   : > { %v1100_v28 = vsel %vm1087_vm7, %v3174_v25, -inf  ;;  %v3182_v29 = vpop.f32.mrb[2].mxu1  ;;  %v3184_v30 = vpop.f32.mrb[3].mxu0  ;;  %v1097_v33 = vsel %vm1087_vm7, %v3178_v27, -inf }
 0x3de   : > { %1101 = vmax.xlane.f32.xlu1 %v1100_v28  ;;  %v3186_v31 = vpop.f32.mrb[3].mxu1  ;;  %v1109_v35 = vsel %vm1087_vm7, %v3182_v29, -inf  ;;  %v1091_v36 = vsel %vm1087_vm7, %v3184_v30, -inf  ;;  %v3306_v28 = vld [vmem:[#allocation5 + $0x40] sm:$0xff] }
 0x3df   : > { %v1103_v37 = vsel %vm1087_vm7, %v3186_v31, -inf }
 0x3e0   : > { %1107 = vmax.xlane.f32.xlu0 %v1106_v32 }
 0x3e2   : > { %1098 = vmax.xlane.f32.xlu1 %v1097_v33 }
 0x3e4   : > { %1089 = vmax.xlane.f32.xlu0 %v1088_v34 }
 0x3e6   : > { %1110 = vmax.xlane.f32.xlu1 %v1109_v35  ;;  %v3316_v35 = vld [vmem:[#allocation5 + $0x78] sm:$0xff] }
 0x3e8   : > { %1092 = vmax.xlane.f32.xlu0 %v1091_v36 }
 0x3ea   : > { %1104 = vmax.xlane.f32.xlu1 %v1103_v37  ;;  %v3200_v38 = vpop.f32.mrb[4].mxu0 }
 0x3eb   : > { %v3202_v39 = vpop.f32.mrb[4].mxu1  ;;  %v3204_v40 = vpop.f32.mrb[5].mxu0  ;;  %v1118_v41 = vsel %vm1087_vm7, %v3200_v38, -inf }
 0x3ec   : > { %v3208_v42 = vpop.f32.mrb[5].mxu1  ;;  %1119 = vmax.xlane.f32.xlu0 %v1118_v41  ;;  %v3210_v44 = vpop.f32.mrb[6].mxu0  ;;  %v1112_v47 = vsel %vm1087_vm7, %v3204_v40, -inf  ;;  %v1130_v53 = vsel %vm1087_vm7, %v3202_v39, -inf }
 0x3ed   : > { %v3212_v45 = vpop.f32.mrb[6].mxu1  ;;  %v1121_v46 = vsel %vm1087_vm7, %v3210_v44, -inf  ;;  %v3218_v48 = vpop.f32.mrb[7].mxu0  ;;  %v1124_v51 = vsel %vm1087_vm7, %v3208_v42, -inf }
 0x3ee   : > { %v3220_v49 = vpop.f32.mrb[7].mxu1  ;;  %1122 = vmax.xlane.f32.xlu1 %v1121_v46  ;;  %v1133_v50 = vsel %vm1087_vm7, %v3212_v45, -inf  ;;  %v1115_v52 = vsel %vm1087_vm7, %v3218_v48, -inf }
 0x3ef   : > { %v1127_v54 = vsel %vm1087_vm7, %v3220_v49, -inf }
 0x3f0   : > { %1113 = vmax.xlane.f32.xlu0 %v1112_v47 }
 0x3f2   : > { %1134 = vmax.xlane.f32.xlu1 %v1133_v50  ;;  %v3334_v50 = vld [vmem:[#allocation5 + $0x48] sm:$0xff] }
 0x3f4   : > { %1125 = vmax.xlane.f32.xlu0 %v1124_v51 }
 0x3f6   : > { %1116 = vmax.xlane.f32.xlu1 %v1115_v52 }
 0x3f8   : > { %1131 = vmax.xlane.f32.xlu0 %v1130_v53 }
 0x3fa   : > { %1128 = vmax.xlane.f32.xlu1 %v1127_v54  ;;  %v3343_v54 = vld [vmem:[#allocation5 + $0x70] sm:$0xff] }
 0x469   : > { %v1096_v57 = vpop.xlane.xlu0 %1095 }
 0x46a   : > { %v3237_v58 = vmax.f32 %v3232_v55, %v1096_v57 }
 0x46b   : > { %v1102_v59 = vpop.xlane.xlu1 %1101 }
 0x46c   : > { %v3240_v60 = vmax.f32 %v3234_v56, %v1102_v59  ;;  %v1154_v62 = vsub.f32 %v3232_v55, %v3237_v58  ;;  %1212 = vperm.xlu1 %2637, %v3237_v58   ;;  %1331 = vst.msk [vmem:[#allocation5 + $0x10] sm:$0xff] %vm1328_vm8, %v3237_v58 }
 0x46d   : > { %v1108_v1 = vpop.xlane.xlu0 %1107 }
 0x46e   : > { %v1156_v0 = vsub.f32 %v3234_v56, %v3240_v60  ;;  %1333 = vst.msk [vmem:[#allocation5 + $0x20] sm:$0xff] %vm1328_vm8, %v3240_v60  ;;  %v3256_v2 = vmax.f32 %v3242_v61, %v1108_v1 }
 0x46f   : > { %v1099_v3 = vpop.xlane.xlu1 %1098 }
 0x470   : > { %v3259_v4 = vmax.f32 %v3247_v63, %v1099_v3  ;;  %v1158_v6 = vsub.f32 %v3242_v61, %v3256_v2  ;;  %1232 = vperm.xlu1 %2637, %v3256_v2   ;;  %1335 = vst.msk [vmem:[#allocation5 + $0x30] sm:$0xff] %vm1328_vm8, %v3256_v2  ;;  %v3353_v3 = vld [vmem:[#allocation5 + $0x68] sm:$0xff] }
 0x471   : > { %v1090_v8 = vpop.xlane.xlu0 %1089 }
 0x472   : > { %1332 = vst.msk [vmem:[#allocation5 + $0x18] sm:$0xff] %vm1328_vm8, %v3259_v4  ;;  %v3273_v9 = vmax.f32 %v3261_v5, %v1090_v8 }
 0x473   : > { %v1111_v10 = vpop.xlane.xlu1 %1110 }
 0x474   : > { %v3276_v11 = vmax.f32 %v3266_v7, %v1111_v10  ;;  %1202 = vperm.xlu0 %2638, %v3273_v9   ;;  %1222 = vperm.xlu1 %2637, %v3240_v60   ;;  %1329 = vst.msk [vmem:[#allocation5] sm:$0xff] %vm1328_vm8, %v3273_v9 }
 0x475   : > { %v1093_v14 = vpop.xlane.xlu0 %1092 }
 0x476   : > { %1336 = vst.msk [vmem:[#allocation5 + $0x38] sm:$0xff] %vm1328_vm8, %v3276_v11  ;;  %v3289_v15 = vmax.f32 %v3278_v12, %v1093_v14 }
 0x477   : > { %v1105_v16 = vpop.xlane.xlu1 %1104 }
 0x478   : > { %v3292_v17 = vmax.f32 %v3282_v13, %v1105_v16  ;;  %1217 = vperm.xlu1 %2637, %v3259_v4   ;;  %1330 = vst.msk [vmem:[#allocation5 + $0x8] sm:$0xff] %vm1328_vm8, %v3289_v15 }
 0x479   : > { %v1120_v19 = vpop.xlane.xlu0 %1119 }
 0x47a   : > { %1334 = vst.msk [vmem:[#allocation5 + $0x28] sm:$0xff] %vm1328_vm8, %v3292_v17  ;;  %v3304_v21 = vmax.f32 %v3294_v18, %v1120_v19 }
 0x47b   : > { %v1123_v26 = vpop.xlane.xlu1 %1122 }
 0x47c   : > { %v1162_v32 = vsub.f32 %v3294_v18, %v3304_v21  ;;  %v3311_v33 = vmax.f32 %v3299_v20, %v1123_v26  ;;  %1237 = vperm.xlu1 %2637, %v3276_v11   ;;  %1339 = vst.msk [vmem:[#allocation5 + $0x50] sm:$0xff] %vm1328_vm8, %v3304_v21  ;;  %v818_v26 = vld [vmem:[%s3374_s15] sm:$0xff] }
 0x47d   : > { %v1114_v34 = vpop.xlane.xlu0 %1113  ;;  %2483 = vmatprep.subr.bf16.mxu0 %v818_v26 }
 0x47e   : > { %v1163_v36 = vsub.f32 %v3299_v20, %v3311_v33  ;;  %v3321_v37 = vmax.f32 %v3306_v28, %v1114_v34  ;;  %1257 = vperm.xlu0 %2638, %v3311_v33   ;;  %1340 = vst.msk [vmem:[#allocation5 + $0x58] sm:$0xff] %vm1328_vm8, %v3311_v33  ;;  %2484 = vmatpush3.bf16.msra.mxu0 %v818_v26  ;;  %v819_v34 = vld [vmem:[%s3374_s15 + $0x8] sm:$0xff] }
 0x47f   : > { %v1135_v41 = vpop.xlane.xlu1 %1134  ;;  %2485 = vmatprep.subr.bf16.mxu0 %v819_v34  ;;  %v1155_v26 = vsub.f32 %v3247_v63, %v3259_v4 }
 0x480   : > { %v3329_v46 = vmax.f32 %v3316_v35, %v1135_v41  ;;  %1207 = vperm.xlu1 %2637, %v3289_v15   ;;  %1337 = vst.msk [vmem:[#allocation5 + $0x40] sm:$0xff] %vm1328_vm8, %v3321_v37  ;;  %v820_v41 = vld [vmem:[%s3374_s15 + $0x20] sm:$0xff] }
 0x481   : > { %v1126_v47 = vpop.xlane.xlu0 %1125  ;;  %2491 = vmatprep.subr.bf16.mxu1 %v820_v41 }
 0x482   : > { %v1167_v51 = vsub.f32 %v3316_v35, %v3329_v46  ;;  %v3339_v52 = vmax.f32 %v3326_v43, %v1126_v47  ;;  %1344 = vst.msk [vmem:[#allocation5 + $0x78] sm:$0xff] %vm1328_vm8, %v3329_v46  ;;  %2486 = vmatpush3.bf16.msra.mxu0 %v819_v34  ;;  %2492 = vmatpush3.bf16.msra.mxu1 %v820_v41  ;;  %v821_v47 = vld [vmem:[%s3374_s15 + $0x28] sm:$0xff] }
 0x483   : > { %v1117_v53 = vpop.xlane.xlu1 %1116  ;;  %2493 = vmatprep.subr.bf16.mxu1 %v821_v47  ;;  %v1152_v41 = vsub.f32 %v3261_v5, %v3273_v9 }
 0x484   : > { %v1164_v57 = vsub.f32 %v3326_v43, %v3339_v52  ;;  %v3348_v59 = vmax.f32 %v3334_v50, %v1117_v53  ;;  %1227 = vperm.xlu1 %2637, %v3292_v17   ;;  %1341 = vst.msk [vmem:[#allocation5 + $0x60] sm:$0xff] %vm1328_vm8, %v3339_v52  ;;  %v3391_v53 = vld [vmem:[%s3374_s15 + $0x40] sm:$0xff] }
 0x485   : > { %v1132_v1 = vpop.xlane.xlu0 %1131  ;;  %2499 = vmatprep.subr.bf16.mxu0 %v3391_v53 }
 0x486   : > { %v3356_v8 = vmax.f32 %v3343_v54, %v1132_v1  ;;  %1247 = vperm.xlu0 %2638, %v3348_v59   ;;  %1338 = vst.msk [vmem:[#allocation5 + $0x48] sm:$0xff] %vm1328_vm8, %v3348_v59  ;;  %2494 = vmatpush3.bf16.msra.mxu1 %v821_v47  ;;  %v3401_v1 = vld [vmem:[%s3374_s15 + $0x60] sm:$0xff]  ;;  %v1168_v47 = vmul.f32 1.442695, %v1152_v41 }
 0x487   : > { %v1129_v10 = vpop.xlane.xlu1 %1128  ;;  %2507 = vmatprep.subr.bf16.mxu1 %v3401_v1 }
 0x488   : > { %v1166_v14 = vsub.f32 %v3343_v54, %v3356_v8  ;;  %v3364_v16 = vmax.f32 %v3353_v3, %v1129_v10  ;;  %1252 = vperm.xlu1 %2637, %v3304_v21   ;;  %1343 = vst.msk [vmem:[#allocation5 + $0x70] sm:$0xff] %vm1328_vm8, %v3356_v8  ;;  %v1153_v10 = vsub.f32 %v3278_v12, %v3289_v15 }
 0x489   : > { %v1157_v15 = vsub.f32 %v3282_v13, %v3292_v17  ;;  %v1160_v17 = vsub.f32 %v3306_v28, %v3321_v37 }
 0x48a   : > { %v1165_v19 = vsub.f32 %v3353_v3, %v3364_v16  ;;  %1267 = vperm.xlu0 %2638, %v3364_v16   ;;  %1342 = vst.msk [vmem:[#allocation5 + $0x68] sm:$0xff] %vm1328_vm8, %v3364_v16  ;;  %v1170_v34 = vmul.f32 1.442695, %v1153_v10 }
 0x48b   : > { %v1178_v4 = vmul.f32 1.442695, %v1157_v15 }
 0x48c   : > { %1242 = vperm.xlu1 %2637, %v3321_v37   ;;  %2639 = vpow2.f32 %v1170_v34 }
 0x48e   : > { %1277 = vperm.xlu0 %2638, %v3329_v46  }
 0x490   : > { %1262 = vperm.xlu1 %2637, %v3339_v52  }
 0x492   : > { %1363 = vrot.lane.b32.xlu0 %v3278_v12, %s2858_s12  ;;  %v1174_v12 = vmul.f32 1.442695, %v1155_v26 }
 0x494   : > { %1272 = vperm.xlu1 %2637, %v3356_v8   ;;  %2641 = vpow2.f32 %v1174_v12 }
 0x495   : > { %2643 = vpow2.f32 %v1168_v47 }
 0x496   : > { %1367 = vrot.lane.b32.xlu0 %v3247_v63, %s2858_s12  ;;  %v1159_v63 = vsub.f32 %v3266_v7, %v3276_v11  ;;  %2645 = vpow2.f32 %v1178_v4  ;;  %v1180_v11 = vmul.f32 1.442695, %v1158_v6 }
 0x498   : > { %1361 = vrot.lane.b32.xlu1 %v3261_v5, %s2858_s12  ;;  %v1172_v5 = vmul.f32 1.442695, %v1154_v62  ;;  %v1182_v9 = vmul.f32 1.442695, %v1159_v63 }
 0x49a   : > { %1371 = vrot.lane.b32.xlu0 %v3282_v13, %s2858_s12  ;;  %v1161_v13 = vsub.f32 %v3334_v50, %v3348_v59  ;;  %2647 = vpow2.f32 %v1172_v5 }
 0x49b   : > { %2649 = vpow2.f32 %v1182_v9 }
 0x49c   : > { %1365 = vrot.lane.b32.xlu1 %v3232_v55, %s2858_s12  ;;  %v1176_v55 = vmul.f32 1.442695, %v1156_v0  ;;  %v1186_v58 = vmul.f32 1.442695, %v1161_v13  ;;  %v1184_v0 = vmul.f32 1.442695, %v1160_v17 }
 0x49e   : > { %1375 = vrot.lane.b32.xlu0 %v3266_v7, %s2858_s12  ;;  %v3439_v7 = vpop.eup %2639  ;;  %2651 = vpow2.f32 %v1176_v55 }
 0x49f   : > { %v3447_v62 = vpop.eup %2641  ;;  %2653 = vpow2.f32 %v1186_v58 }
 0x4a0   : > { %1369 = vrot.lane.b32.xlu1 %v3234_v56, %s2858_s12  ;;  %v3455_v56 = vpop.eup %2643  ;;  %2655 = vpow2.f32 %v1180_v11 }
 0x4a1   : > { %v3458_v60 = vpop.eup %2645  ;;  %2657 = vpow2.f32 %v1184_v0 }
 0x4a2   : > { %1379 = vrot.lane.b32.xlu0 %v3334_v50, %s2858_s12 }
 0x4a4   : > { %1373 = vrot.lane.b32.xlu1 %v3242_v61, %s2858_s12  ;;  %v3461_v50 = vpop.eup %2647 }
 0x4a5   : > { %v3464_v61 = vpop.eup %2649 }
 0x4a6   : > { %1383 = vrot.lane.b32.xlu0 %v3299_v20, %s2858_s12 }
 0x4a8   : > { %1377 = vrot.lane.b32.xlu1 %v3306_v28, %s2858_s12  ;;  %v3467_v2 = vpop.eup %2651 }
 0x4a9   : > { %v3470_v6 = vpop.eup %2653 }
 0x4aa   : > { %1387 = vrot.lane.b32.xlu0 %v3353_v3, %s2858_s12  ;;  %v3473_v28 = vpop.eup %2655  ;;  %v1198_v3 = vmul.f32 1.442695, %v1167_v51 }
 0x4ab   : > { %v3476_v37 = vpop.eup %2657 }
 0x4ac   : > { %1381 = vrot.lane.b32.xlu1 %v3294_v18, %s2858_s12 }
 0x4ae   : > { %1391 = vrot.lane.b32.xlu0 %v3316_v35, %s2858_s12 }
 0x4b0   : > { %1385 = vrot.lane.b32.xlu1 %v3326_v43, %s2858_s12  ;;  %v1196_v43 = vmul.f32 1.442695, %v1166_v14 }
 0x4b2   : > { %1593 = vperm.xlu0 %2638, %v3439_v7  }
 0x4b4   : > { %1389 = vrot.lane.b32.xlu1 %v3343_v54, %s2858_s12 }
 0x4b6   : > { %1603 = vperm.xlu0 %2638, %v3447_v62  }
 0x4b8   : > { %1588 = vperm.xlu1 %2637, %v3455_v56  }
 0x4ba   : > { %1613 = vperm.xlu0 %2638, %v3458_v60  }
 0x4bc   : > { %1598 = vperm.xlu1 %2637, %v3461_v50  }
 0x4be   : > { %1623 = vperm.xlu0 %2638, %v3464_v61  }
 0x4c0   : > { %1608 = vperm.xlu1 %2637, %v3467_v2  }
 0x4c2   : > { %1633 = vperm.xlu0 %2638, %v3470_v6  }
 0x4c4   : > { %1618 = vperm.xlu1 %2637, %v3473_v28  }
 0x4c8   : > { %1628 = vperm.xlu1 %2637, %v3476_v37  }
 0x4eb   : > { %v1213_v59 = vpop.permute.xlu1 %1212 }
 0x4ec   : > { %v1282_v10 = vsub.f32 %v3168_v22, %v1213_v59 }
 0x4ee   : > { %v1300_v26 = vmul.f32 1.442695, %v1282_v10 }
 0x4ef   : > { %v1233_v34 = vpop.permute.xlu1 %1232 }
 0x4f0   : > { %2659 = vpow2.f32 %v1300_v26  ;;  %v1286_v41 = vsub.f32 %v3170_v23, %v1233_v34 }
 0x4f2   : > { %v1308_v12 = vmul.f32 1.442695, %v1286_v41 }
 0x4f3   : > { %v1203_v15 = vpop.permute.xlu0 %1202  ;;  %v1223_v47 = vpop.permute.xlu1 %1222 }
 0x4f4   : > { %2661 = vpow2.f32 %v1308_v12  ;;  %v1280_v63 = vsub.f32 %v3172_v24, %v1203_v15  ;;  %v1284_v4 = vsub.f32 %v3174_v25, %v1223_v47 }
 0x4f6   : > { %v1296_v5 = vmul.f32 1.442695, %v1280_v63  ;;  %v1304_v9 = vmul.f32 1.442695, %v1284_v4 }
 0x4f7   : > { %v1218_v13 = vpop.permute.xlu1 %1217 }
 0x4f8   : > { %2663 = vpow2.f32 %v1296_v5  ;;  %v1283_v55 = vsub.f32 %v3178_v27, %v1218_v13 }
 0x4f9   : > { %2665 = vpow2.f32 %v1304_v9 }
 0x4fa   : > { %v3484_v22 = vpop.eup %2659  ;;  %v1302_v58 = vmul.f32 1.442695, %v1283_v55 }
 0x4fb   : > { %v1238_v11 = vpop.permute.xlu1 %1237  ;;  %v1431_v23 = vsel %vm1087_vm7, %v3484_v22, 0.0 }
 0x4fc   : > { %2667 = vpow2.f32 %v1302_v58  ;;  %v1287_v17 = vsub.f32 %v3182_v29, %v1238_v11  ;;  %1432 = vadd.xlane.f32.xlu0 %v1431_v23 }
 0x4fd   : > { %v1258_v0 = vpop.permute.xlu0 %1257 }
 0x4fe   : > { %v3489_v24 = vpop.eup %2661  ;;  %v1310_v25 = vmul.f32 1.442695, %v1287_v17  ;;  %v1291_v34 = vsub.f32 %v3210_v44, %v1258_v0 }
 0x4ff   : > { %v1208_v59 = vpop.permute.xlu1 %1207  ;;  %v1443_v27 = vsel %vm1087_vm7, %v3489_v24, 0.0 }
 0x500   : > { %2669 = vpow2.f32 %v1310_v25  ;;  %v1281_v10 = vsub.f32 %v3184_v30, %v1208_v59  ;;  %1444 = vadd.xlane.f32.xlu0 %v1443_v27  ;;  %v1318_v5 = vmul.f32 1.442695, %v1291_v34 }
 0x502   : > { %v2664_v26 = vpop.eup %2663  ;;  %v1298_v41 = vmul.f32 1.442695, %v1281_v10 }
 0x503   : > { %v3495_v12 = vpop.eup %2665  ;;  %v1228_v29 = vpop.permute.xlu1 %1227  ;;  %v1425_v15 = vsel %vm1087_vm7, %v2664_v26, 0.0 }
 0x504   : > { %2671 = vpow2.f32 %v1298_v41  ;;  %v1285_v47 = vsub.f32 %v3186_v31, %v1228_v29  ;;  %1426 = vadd.xlane.f32.xlu1 %v1425_v15  ;;  %v1437_v63 = vsel %vm1087_vm7, %v3495_v12, 0.0 }
 0x505   : > { %1438 = vadd.xlane.f32.xlu0 %v1437_v63  ;;  %v1248_v4 = vpop.permute.xlu0 %1247 }
 0x506   : > { %v2668_v30 = vpop.eup %2667  ;;  %v1306_v9 = vmul.f32 1.442695, %v1285_v47  ;;  %v1289_v44 = vsub.f32 %v3218_v48, %v1248_v4 }
 0x507   : > { %v1253_v13 = vpop.permute.xlu1 %1252  ;;  %v1434_v55 = vsel %vm1087_vm7, %v2668_v30, 0.0  ;;  %v1683_v58 = vpack.c.bf16 %v2668_v30, %v3484_v22 }
 0x508   : > { %2673 = vpow2.f32 %v1306_v9  ;;  %v1290_v11 = vsub.f32 %v3200_v38, %v1253_v13  ;;  %1435 = vadd.xlane.f32.xlu1 %v1434_v55  ;;  %v1314_v25 = vmul.f32 1.442695, %v1289_v44 }
 0x509   : > { %v1268_v31 = vpop.permute.xlu0 %1267  ;;  %2675 = vpow2.f32 %v1318_v5 }
 0x50a   : > { %v2670_v23 = vpop.eup %2669  ;;  %v1316_v17 = vmul.f32 1.442695, %v1290_v11  ;;  %v1293_v0 = vsub.f32 %v3220_v49, %v1268_v31  ;;  %v825_v11 = vld [vmem:[%s3374_s15 + $0x68] sm:$0xff] }
 0x50b   : > { %v1243_v59 = vpop.permute.xlu1 %1242  ;;  %v1446_v27 = vsel %vm1087_vm7, %v2670_v23, 0.0  ;;  %v1685_v48 = vpack.c.bf16 %v2670_v23, %v3489_v24 }
 0x50c   : > { %2677 = vpow2.f32 %v1316_v17  ;;  %v1288_v10 = vsub.f32 %v3204_v40, %v1243_v59  ;;  %1447 = vadd.xlane.f32.xlu1 %v1446_v27  ;;  %v1322_v29 = vmul.f32 1.442695, %v1293_v0  ;;  %v823_v40 = vld [vmem:[%s3374_s15 + $0x48] sm:$0xff]  ;;  %v1194_v0 = vmul.f32 1.442695, %v1165_v19 }
 0x50d   : > { %v1278_v22 = vpop.permute.xlu0 %1277  ;;  %2679 = vpow2.f32 %v1314_v25 }
 0x50e   : > { %v2672_v38 = vpop.eup %2671  ;;  %v1312_v34 = vmul.f32 1.442695, %v1288_v10  ;;  %v1295_v41 = vsub.f32 %v3212_v45, %v1278_v22 }
 0x50f   : > { %v1263_v15 = vpop.permute.xlu1 %1262  ;;  %v1428_v49 = vsel %vm1087_vm7, %v2672_v38, 0.0  ;;  %v1682_v47 = vpack.c.bf16 %v2672_v38, %v2664_v26 }
 0x510   : > { %2681 = vpow2.f32 %v1312_v34  ;;  %v1326_v63 = vmul.f32 1.442695, %v1295_v41  ;;  %v1292_v24 = vsub.f32 %v3208_v42, %v1263_v15  ;;  %1429 = vadd.xlane.f32.xlu0 %v1428_v49  ;;  %v1192_v34 = vmul.f32 1.442695, %v1164_v57 }
 0x511   : > { %v3512_v4 = vpop.permute.xlu0 %1363  ;;  %2487 = vmatprep.mubr.msk.bf16.mxu0 %vm1087_vm7, %v1682_v47 }
 0x512   : > { %v2674_v30 = vpop.eup %2673  ;;  %2683 = vpow2.f32 %v1326_v63  ;;  %v1320_v5 = vmul.f32 1.442695, %v1292_v24  ;;  %2488 = vmatmul.mubr.msk.bf16.vlgmr.msra.gmra.mrb[8].mxu0 %vm1087_vm7, %v1683_v58  ;;  %v1188_v63 = vmul.f32 1.442695, %v1162_v32  ;;  %v1190_v32 = vmul.f32 1.442695, %v1163_v36 }
 0x513   : > { %2685 = vpow2.f32 %v1322_v29  ;;  %v1273_v45 = vpop.permute.xlu1 %1272  ;;  %v1440_v26 = vsel %vm1087_vm7, %v2674_v30, 0.0  ;;  %v1684_v9 = vpack.c.bf16 %v2674_v30, %v3495_v12  ;;  %2500 = vmatpush3.bf16.msra.mxu0 %v3391_v53  ;;  %v2676_v42 = vpop.eup %2675 }
 0x514   : > { %2687 = vpow2.f32 %v1320_v5  ;;  %v1294_v44 = vsub.f32 %v3202_v39, %v1273_v45  ;;  %1441 = vadd.xlane.f32.xlu1 %v1440_v26  ;;  %2501 = vmatprep.subr.bf16.mxu0 %v823_v40  ;;  %v1458_v12 = vsel %vm1087_vm7, %v2676_v42, 0.0 }
 0x515   : > { %v3521_v13 = vpop.permute.xlu0 %1367  ;;  %2495 = vmatprep.mubr.msk.bf16.mxu1 %vm1087_vm7, %v1684_v9 }
 0x516   : > { %v2678_v55 = vpop.eup %2677  ;;  %v1324_v58 = vmul.f32 1.442695, %v1294_v44  ;;  %2496 = vmatmul.mubr.msk.bf16.vlgmr.msra.gmra.mrb[8].mxu1 %vm1087_vm7, %v1685_v48 }
 0x517   : > { %v3526_v31 = vpop.permute.xlu1 %1361  ;;  %v1455_v53 = vsel %vm1087_vm7, %v2678_v55, 0.0  ;;  %2502 = vmatpush3.bf16.msra.mxu0 %v823_v40  ;;  %2508 = vmatpush3.bf16.msra.mxu1 %v3401_v1  ;;  %v1687_v39 = vpack.c.bf16 %v2676_v42, %v2678_v55  ;;  %v2680_v23 = vpop.eup %2679 }
 0x518   : > { %2689 = vpow2.f32 %v1324_v58  ;;  %1459 = vadd.xlane.f32.xlu1 %v1458_v12  ;;  %1456 = vadd.xlane.f32.xlu0 %v1455_v53  ;;  %v1452_v29 = vsel %vm1087_vm7, %v2680_v23, 0.0 }
 0x519   : > { %v3531_v17 = vpop.permute.xlu0 %1371  ;;  %2509 = vmatprep.subr.bf16.mxu1 %v825_v11  ;;  %2691 = vpow2.f32 %v1194_v0 }
 0x51a   : > { %v2682_v25 = vpop.eup %2681  ;;  %2693 = vpow2.f32 %v1198_v3 }
 0x51b   : > { %v3536_v59 = vpop.permute.xlu1 %1365  ;;  %v1686_v27 = vpack.c.bf16 %v2680_v23, %v2682_v25  ;;  %2510 = vmatpush3.bf16.msra.mxu1 %v825_v11  ;;  %2695 = vpow2.f32 %v1192_v34  ;;  %v1449_v47 = vsel %vm1087_vm7, %v2682_v25, 0.0 }
 0x51c   : > { %v2684_v48 = vpop.eup %2683  ;;  %2697 = vpow2.f32 %v1196_v43  ;;  %v1411_v0 = vmul.f32 %v3461_v50, %v3536_v59 }
 0x51d   : > { %v2686_v10 = vpop.eup %2685  ;;  %v3538_v1 = vpop.permute.xlu0 %1375  ;;  %2503 = vmatprep.mubr.msk.bf16.mxu0 %vm1087_vm7, %v1686_v27  ;;  %v1470_v22 = vsel %vm1087_vm7, %v2684_v48, 0.0  ;;  %2699 = vpow2.f32 %v1188_v63 }
 0x51e   : > { %v2688_v38 = vpop.eup %2687  ;;  %1471 = vadd.xlane.f32.xlu1 %v1470_v22  ;;  %2504 = vmatmul.mubr.msk.bf16.vlgmr.msra.gmra.mrb[12].mxu0 %vm1087_vm7, %v1687_v39  ;;  %v1464_v52 = vsel %vm1087_vm7, %v2686_v10, 0.0  ;;  %2701 = vpow2.f32 %v1190_v32  ;;  %v1571_v32 = vld [vmem:[#allocation6 + $0x8] sm:$0xff] }
 0x51f   : > { %v3546_v16 = vpop.permute.xlu1 %1369  ;;  %v1688_v19 = vpack.c.bf16 %v2686_v10, %v2688_v38  ;;  %v1461_v40 = vsel %vm1087_vm7, %v2688_v38, 0.0 }
 0x520   : > { %v1413_v34 = vmul.f32 %v3467_v2, %v3546_v16  ;;  %v1410_v16 = vmul.f32 %v3439_v7, %v3512_v4 }
 0x521   : > { %v3551_v41 = vpop.permute.xlu0 %1379  ;;  %2511 = vmatprep.mubr.msk.bf16.mxu1 %vm1087_vm7, %v1688_v19  ;;  %v1409_v19 = vmul.f32 %v3455_v56, %v3526_v31  ;;  %v1416_v56 = vmul.f32 %v3464_v61, %v3538_v1 }
 0x522   : > { %v2690_v15 = vpop.eup %2689  ;;  %1453 = vadd.xlane.f32.xlu1 %v1452_v29 }
 0x523   : > { %v1374_v49 = vpop.permute.xlu1 %1373  ;;  %v1467_v35 = vsel %vm1087_vm7, %v2690_v15, 0.0  ;;  %v1689_v46 = vpack.c.bf16 %v2684_v48, %v2690_v15  ;;  %v2692_v24 = vpop.eup %2691 }
 0x524   : > { %1468 = vadd.xlane.f32.xlu0 %v1467_v35  ;;  %v2694_v30 = vpop.eup %2693  ;;  %v1415_v10 = vmul.f32 %v3473_v28, %v1374_v49  ;;  %v1412_v28 = vmul.f32 %v3447_v62, %v3521_v13  ;;  %v1414_v13 = vmul.f32 %v3458_v60, %v3531_v17  ;;  %v1418_v60 = vmul.f32 %v3470_v6, %v3551_v41 }
 0x525   : > { %v3559_v51 = vpop.permute.xlu0 %1383  ;;  %2512 = vmatmul.mubr.msk.bf16.vlgmr.msra.gmra.mrb[12].mxu1 %vm1087_vm7, %v1689_v46  ;;  %v2696_v26 = vpop.eup %2695 }
 0x526   : > { %1465 = vadd.xlane.f32.xlu1 %v1464_v52  ;;  %v2698_v21 = vpop.eup %2697 }
 0x527   : > { %v3563_v57 = vpop.permute.xlu1 %1377  ;;  %v2700_v55 = vpop.eup %2699 }
 0x528   : > { %1450 = vadd.xlane.f32.xlu0 %v1449_v47  ;;  %v2702_v58 = vpop.eup %2701 }
 0x529   : > { %v1388_v54 = vpop.permute.xlu0 %1387  ;;  %v1420_v61 = vmul.f32 %v2702_v58, %v3559_v51 }
 0x52a   : > { %v3569_v8 = vmul.f32 %v2692_v24, %v1388_v54 }
 0x52b   : > { %v3571_v14 = vpop.permute.xlu1 %1381 }
 0x52c   : > { %1462 = vadd.xlane.f32.xlu0 %v1461_v40  ;;  %v1419_v1 = vmul.f32 %v2700_v55, %v3571_v14  ;;  %v1417_v14 = vmul.f32 %v3476_v37, %v3563_v57  ;;  %v1572_v37 = vld [vmem:[#allocation6 + $0x10] sm:$0xff]  ;;  %v1570_v57 = vld [vmem:[#allocation6] sm:$0xff] }
 0x52d   : > { %v1392_v5 = vpop.permute.xlu0 %1391 }
 0x52e   : > { %v3574_v45 = vmul.f32 %v2694_v30, %v1392_v5 }
 0x52f   : > { %v1386_v9 = vpop.permute.xlu1 %1385 }
 0x530   : > { %v3576_v18 = vmul.f32 %v2696_v26, %v1386_v9 }
 0x531   : > { %v3583_v11 = vpop.permute.xlu0 %1593 }
 0x533   : > { %v1390_v42 = vpop.permute.xlu1 %1389 }
 0x534   : > { %v3581_v44 = vmul.f32 %v2698_v21, %v1390_v42 }
 0x535   : > { %v3585_v12 = vpop.permute.xlu0 %1603 }
 0x537   : > { %1638 = vperm.xlu1 %2637, %v2700_v55   ;;  %v3587_v53 = vpop.permute.xlu1 %1588  ;;  %v1576_v55 = vld [vmem:[#allocation6 + $0x30] sm:$0xff] }
 0x539   : > { %v3589_v20 = vpop.permute.xlu0 %1613 }
 0x53b   : > { %1648 = vperm.xlu1 %2637, %v2696_v26   ;;  %v3591_v33 = vpop.permute.xlu1 %1598 }
 0x53c   : > { %v1668_v42 = vmul.f32 %v3591_v33, %v1572_v37 }
 0x53d   : > { %v3593_v36 = vpop.permute.xlu0 %1623 }
 0x53f   : > { %1658 = vperm.xlu1 %2637, %v2698_v21   ;;  %v3595_v39 = vpop.permute.xlu1 %1608 }
 0x541   : > { %v3597_v23 = vpop.permute.xlu0 %1633 }
 0x542   : > { %1643 = vperm.xlu0 %2638, %v2702_v58  }
 0x543   : > { %v3599_v25 = vpop.permute.xlu1 %1618 }
 0x546   : > { %1653 = vperm.xlu0 %2638, %v2692_v24  }
 0x547   : > { %v3605_v22 = vpop.permute.xlu1 %1628 }
 0x54a   : > { %1663 = vperm.xlu0 %2638, %v2694_v30  }
 0x589   : > { %v1433_v27 = vpop.xlane.xlu0 %1432 }
 0x58a   : > { %v1475_v48 = vadd.f32 %v1433_v27, %v1411_v0  ;;  %v1574_v0 = vld [vmem:[#allocation6 + $0x20] sm:$0xff] }
 0x58c   : > { %1509 = vrot.lane.b32.xlu1 %v1475_v48, %s2859_s20 }
 0x58d   : > { %v1445_v38 = vpop.xlane.xlu0 %1444 }
 0x58e   : > { %v1479_v3 = vadd.f32 %v1445_v38, %v1415_v10  ;;  %v1667_v10 = vmul.f32 %v3583_v11, %v1571_v32 }
 0x590   : > { %1517 = vrot.lane.b32.xlu1 %v1479_v3, %s2859_s20 }
 0x591   : > { %v1427_v50 = vpop.xlane.xlu1 %1426 }
 0x592   : > { %v1439_v59 = vpop.xlane.xlu0 %1438  ;;  %v1473_v29 = vadd.f32 %v1427_v50, %v1409_v19  ;;  %v1575_v19 = vld [vmem:[#allocation6 + $0x28] sm:$0xff] }
 0x593   : > { %v1477_v15 = vadd.f32 %v1439_v59, %v1413_v34  ;;  %v1672_v34 = vmul.f32 %v3599_v25, %v1576_v55  ;;  %v1670_v59 = vmul.f32 %v3595_v39, %v1574_v0  ;;  %v1671_v25 = vmul.f32 %v3589_v20, %v1575_v19  ;;  %v1579_v20 = vld [vmem:[#allocation6 + $0x48] sm:$0xff] }
 0x594   : > { %1505 = vrot.lane.b32.xlu0 %v1473_v29, %s2859_s20 }
 0x595   : > { %1513 = vrot.lane.b32.xlu1 %v1477_v15, %s2859_s20  ;;  %v1436_v49 = vpop.xlane.xlu1 %1435 }
 0x596   : > { %v1476_v35 = vadd.f32 %v1436_v49, %v1412_v28 }
 0x598   : > { %1511 = vrot.lane.b32.xlu0 %v1476_v35, %s2859_s20 }
 0x599   : > { %v1448_v31 = vpop.xlane.xlu1 %1447 }
 0x59a   : > { %v1480_v2 = vadd.f32 %v1448_v31, %v1416_v56 }
 0x59c   : > { %1519 = vrot.lane.b32.xlu0 %v1480_v2, %s2859_s20  ;;  %v1580_v2 = vld [vmem:[#allocation6 + $0x50] sm:$0xff] }
 0x59d   : > { %v1430_v46 = vpop.xlane.xlu0 %1429 }
 0x59e   : > { %v1474_v62 = vadd.f32 %v1430_v46, %v1410_v16 }
 0x5a0   : > { %1507 = vrot.lane.b32.xlu1 %v1474_v62, %s2859_s20  ;;  %v1581_v62 = vld [vmem:[#allocation6 + $0x58] sm:$0xff] }
 0x5a1   : > { %v1442_v43 = vpop.xlane.xlu1 %1441 }
 0x5a2   : > { %v1478_v52 = vadd.f32 %v1442_v43, %v1414_v13 }
 0x5a4   : > { %1515 = vrot.lane.b32.xlu0 %v1478_v52, %s2859_s20 }
 0x5a5   : > { %v1457_v47 = vpop.xlane.xlu0 %1456  ;;  %v1460_v63 = vpop.xlane.xlu1 %1459 }
 0x5a6   : > { %v1483_v7 = vadd.f32 %v1457_v47, %v1419_v1  ;;  %v1484_v4 = vadd.f32 %v1460_v63, %v1420_v61 }
 0x5a8   : > { %1525 = vrot.lane.b32.xlu1 %v1483_v7, %s2859_s20  ;;  %1527 = vrot.lane.b32.xlu0 %v1484_v4, %s2859_s20  ;;  %v1675_v7 = vmul.f32 %v3597_v23, %v1579_v20 }
 0x5ab   : > { %v1472_v24 = vpop.xlane.xlu1 %1471 }
 0x5ac   : > { %v1488_v9 = vadd.f32 %v1472_v24, %v3574_v45  ;;  %v1666_v45 = vmul.f32 %v3587_v53, %v1570_v57 }
 0x5af   : > { %v1454_v17 = vpop.xlane.xlu1 %1453 }
 0x5b0   : > { %v1482_v54 = vadd.f32 %v1454_v17, %v1418_v60  ;;  %v1584_v60 = vld [vmem:[#allocation6 + $0x70] sm:$0xff] }
 0x5b1   : > { %v1469_v40 = vpop.xlane.xlu0 %1468 }
 0x5b2   : > { %1523 = vrot.lane.b32.xlu0 %v1482_v54, %s2859_s20  ;;  %v1487_v21 = vadd.f32 %v1469_v40, %v3581_v44  ;;  %v1577_v44 = vld [vmem:[#allocation6 + $0x38] sm:$0xff] }
 0x5b3   : > { %v1466_v51 = vpop.xlane.xlu1 %1465  ;;  %v1673_v15 = vmul.f32 %v3593_v36, %v1577_v44  ;;  %v1578_v36 = vld [vmem:[#allocation6 + $0x40] sm:$0xff] }
 0x5b4   : > { %v1486_v30 = vadd.f32 %v1466_v51, %v3569_v8  ;;  %v1573_v8 = vld [vmem:[#allocation6 + $0x18] sm:$0xff]  ;;  %v1674_v52 = vmul.f32 %v3605_v22, %v1578_v36  ;;  %v1582_v51 = vld [vmem:[#allocation6 + $0x60] sm:$0xff] }
 0x5b5   : > { %v1451_v5 = vpop.xlane.xlu0 %1450 }
 0x5b6   : > { %v1481_v26 = vadd.f32 %v1451_v5, %v1417_v14  ;;  %1531 = vrot.lane.b32.xlu0 %v1486_v30, %s2859_s20  ;;  %v1585_v30 = vld [vmem:[#allocation6 + $0x78] sm:$0xff] }
 0x5b7   : > { %v1639_v50 = vpop.permute.xlu1 %1638 }
 0x5b8   : > { %1521 = vrot.lane.b32.xlu1 %v1481_v26, %s2859_s20  ;;  %v1676_v13 = vmul.f32 %v1639_v50, %v1580_v2  ;;  %v1583_v26 = vld [vmem:[#allocation6 + $0x68] sm:$0xff] }
 0x5b9   : > { %v1463_v6 = vpop.xlane.xlu0 %1462 }
 0x5ba   : > { %v1485_v41 = vadd.f32 %v1463_v6, %v3576_v18  ;;  %1535 = vrot.lane.b32.xlu0 %v1488_v9, %s2859_s20  ;;  %v1669_v18 = vmul.f32 %v3585_v12, %v1573_v8 }
 0x5bb   : > { %v1649_v46 = vpop.permute.xlu1 %1648 }
 0x5bc   : > { %1529 = vrot.lane.b32.xlu1 %v1485_v41, %s2859_s20  ;;  %v1678_v23 = vmul.f32 %v1649_v46, %v1582_v51 }
 0x5bf   : > { %v1659_v17 = vpop.permute.xlu1 %1658 }
 0x5c0   : > { %1533 = vrot.lane.b32.xlu1 %v1487_v21, %s2859_s20  ;;  %v1680_v5 = vmul.f32 %v1659_v17, %v1584_v60 }
 0x5c1   : > { %v1644_v11 = vpop.permute.xlu0 %1643 }
 0x5c2   : > { %v1677_v1 = vmul.f32 %v1644_v11, %v1581_v62  ;;  %v2860_v11 = vmov (!%p2376_p5), 1  }
 0x5c3   : > { %2704 = vset.pattern.permute.xlu1 (!%p2376_p5), %v2860_v11  ;;  %2703 = vset.pattern.permute.xlu0 (!%p2376_p5), %v2860_v11 }
 0x5c5   : > { %v1654_v43 = vpop.permute.xlu0 %1653 }
 0x5c6   : > { %v1679_v37 = vmul.f32 %v1654_v43, %v1583_v26 }
 0x5c9   : > { %v1664_v22 = vpop.permute.xlu0 %1663 }
 0x5ca   : > { %v1681_v6 = vmul.f32 %v1664_v22, %v1585_v30 }
 0x5e5   : > { %v2489_v58 = vpop.f32.mrb[8].mxu0 }
 0x5e6   : > { %v1912_v27 = vadd.f32 %v2489_v58, %v1668_v42  ;;  %v1730_v48 = vpop.f32.mrb[9].mxu0 }
 0x5e7   : > { %v1910_v38 = vadd.f32 %v1730_v48, %v1666_v45  ;;  %v2490_v3 = vpop.f32.mrb[10].mxu0 }
 0x5e8   : > { %1928 = vst.msk [vmem:[#allocation6 + $0x10] sm:$0xff] %vm826_vm6, %v1912_v27  ;;  %v1913_v33 = vadd.f32 %v2490_v3, %v1669_v18  ;;  %v1733_v53 = vpop.f32.mrb[11].mxu0 }
 0x5e9   : > { %1926 = vst.msk [vmem:[#allocation6] sm:$0xff] %vm826_vm6, %v1910_v38  ;;  %v1911_v12 = vadd.f32 %v1733_v53, %v1667_v10  ;;  %v2497_v29 = vpop.f32.mrb[8].mxu1 }
 0x5ea   : > { %1929 = vst.msk [vmem:[#allocation6 + $0x18] sm:$0xff] %vm826_vm6, %v1913_v33  ;;  %v1916_v28 = vadd.f32 %v2497_v29, %v1672_v34  ;;  %v1785_v49 = vpop.f32.mrb[9].mxu1 }
 0x5eb   : > { %1927 = vst.msk [vmem:[#allocation6 + $0x8] sm:$0xff] %vm826_vm6, %v1911_v12  ;;  %v1914_v35 = vadd.f32 %v1785_v49, %v1670_v59  ;;  %v2498_v56 = vpop.f32.mrb[10].mxu1 }
 0x5ec   : > { %1932 = vst.msk [vmem:[#allocation6 + $0x30] sm:$0xff] %vm826_vm6, %v1916_v28  ;;  %v1917_v39 = vadd.f32 %v2498_v56, %v1673_v15  ;;  %v1788_v31 = vpop.f32.mrb[11].mxu1 }
 0x5ed   : > { %1930 = vst.msk [vmem:[#allocation6 + $0x20] sm:$0xff] %vm826_vm6, %v1914_v35  ;;  %v1915_v16 = vadd.f32 %v1788_v31, %v1671_v25 }
 0x5ee   : > { %1933 = vst.msk [vmem:[#allocation6 + $0x38] sm:$0xff] %vm826_vm6, %v1917_v39 }
 0x5ef   : > { %1931 = vst.msk [vmem:[#allocation6 + $0x28] sm:$0xff] %vm826_vm6, %v1915_v16 }
 0x5f1   : > { %v2505_v61 = vpop.f32.mrb[12].mxu0 }
 0x5f2   : > { %v1920_v47 = vadd.f32 %v2505_v61, %v1676_v13  ;;  %v1840_v63 = vpop.f32.mrb[13].mxu0  ;;  %v1979_v11 = vld [vmem:[#allocation6 + $0x8] sm:$0xff] (!%p2376_p5) }
 0x5f3   : > { %v1918_v4 = vadd.f32 %v1840_v63, %v1674_v52  ;;  %v2506_v24 = vpop.f32.mrb[14].mxu0 }
 0x5f4   : > { %1936 = vst.msk [vmem:[#allocation6 + $0x50] sm:$0xff] %vm826_vm6, %v1920_v47  ;;  %v1921_v54 = vadd.f32 %v2506_v24, %v1677_v1  ;;  %v1843_v40 = vpop.f32.mrb[15].mxu0  ;;  %v1982_v30 = vld [vmem:[#allocation6 + $0x20] sm:$0xff] (!%p2376_p5) }
 0x5f5   : > { %1934 = vst.msk [vmem:[#allocation6 + $0x40] sm:$0xff] %vm826_vm6, %v1918_v4  ;;  %v1919_v14 = vadd.f32 %v1843_v40, %v1675_v7 }
 0x5f6   : > { %1937 = vst.msk [vmem:[#allocation6 + $0x58] sm:$0xff] %vm826_vm6, %v1921_v54 }
 0x5f7   : > { %1935 = vst.msk [vmem:[#allocation6 + $0x48] sm:$0xff] %vm826_vm6, %v1919_v14 }
 0x5f8   : > { %v2513_v9 = vpop.f32.mrb[12].mxu1 }
 0x5f9   : > { %v1924_v41 = vadd.f32 %v2513_v9, %v1680_v5  ;;  %v1895_v21 = vpop.f32.mrb[13].mxu1  ;;  %v1984_v5 = vld [vmem:[#allocation6 + $0x30] sm:$0xff] (!%p2376_p5)  ;;  %v1983_v9 = vld [vmem:[#allocation6 + $0x28] sm:$0xff] (!%p2376_p5) }
 0x5fa   : > { %v1922_v57 = vadd.f32 %v1895_v21, %v1678_v23  ;;  %v2514_v8 = vpop.f32.mrb[14].mxu1 }
 0x5fb   : > { %1940 = vst.msk [vmem:[#allocation6 + $0x70] sm:$0xff] %vm826_vm6, %v1924_v41  ;;  %v1925_v32 = vadd.f32 %v2514_v8, %v1681_v6  ;;  %v1898_v42 = vpop.f32.mrb[15].mxu1 }
 0x5fc   : > { %1938 = vst.msk [vmem:[#allocation6 + $0x60] sm:$0xff] %vm826_vm6, %v1922_v57  ;;  %v1923_v45 = vadd.f32 %v1898_v42, %v1679_v37  ;;  %v1985_v57 = vld [vmem:[#allocation6 + $0x38] sm:$0xff] (!%p2376_p5)  ;;  %v1986_v8 = vld [vmem:[#allocation6 + $0x40] sm:$0xff] (!%p2376_p5) }
 0x5fd   : > { %1941 = vst.msk [vmem:[#allocation6 + $0x78] sm:$0xff] %vm826_vm6, %v1925_v32 }
 0x5fe   : > { %1939 = vst.msk [vmem:[#allocation6 + $0x68] sm:$0xff] %vm826_vm6, %v1923_v45  ;;  %v1510_v55 = vpop.permute.xlu1 %1509 }
 0x5ff   : > { %1556 = vst.msk [vmem:[#allocation5 + $0x10] sm:$0xff] %vm1553_vm9, %v1510_v55 }
 0x602   : > { %v1518_v58 = vpop.permute.xlu1 %1517 }
 0x603   : > { %1560 = vst.msk [vmem:[#allocation5 + $0x30] sm:$0xff] %vm1553_vm9, %v1518_v58  ;;  %v1987_v58 = vld [vmem:[#allocation6 + $0x48] sm:$0xff] (!%p2376_p5) }
 0x606   : > { %v1506_v18 = vpop.permute.xlu0 %1505  ;;  %v1948_v4 = vld [vmem:[#allocation5 + $0x10] sm:$0xff] (!%p2376_p5) }
 0x607   : > { %1554 = vst.msk [vmem:[#allocation5] sm:$0xff] %vm1553_vm9, %v1506_v18  ;;  %v1514_v0 = vpop.permute.xlu1 %1513  ;;  %v1988_v18 = vld [vmem:[#allocation6 + $0x50] sm:$0xff] (!%p2376_p5) }
 0x608   : > { %1558 = vst.msk [vmem:[#allocation5 + $0x20] sm:$0xff] %vm1553_vm9, %v1514_v0 }
 0x60a   : > { %v1512_v27 = vpop.permute.xlu0 %1511  ;;  %v1952_v12 = vld [vmem:[#allocation5 + $0x30] sm:$0xff] (!%p2376_p5) }
 0x60b   : > { %1557 = vst.msk [vmem:[#allocation5 + $0x18] sm:$0xff] %vm1553_vm9, %v1512_v27  ;;  %2705 = vrcp.f32 (!%p2376_p5), %v1952_v12 }
 0x60e   : > { %v1520_v48 = vpop.permute.xlu0 %1519  ;;  %v1946_v1 = vld [vmem:[#allocation5] sm:$0xff] (!%p2376_p5) }
 0x60f   : > { %1561 = vst.msk [vmem:[#allocation5 + $0x38] sm:$0xff] %vm1553_vm9, %v1520_v48  ;;  %v1950_v29 = vld [vmem:[#allocation5 + $0x20] sm:$0xff] (!%p2376_p5) }
 0x610   : > { %2707 = vrcp.f32 (!%p2376_p5), %v1950_v29 }
 0x612   : > { %v1508_v10 = vpop.permute.xlu1 %1507  ;;  %v1949_v63 = vld [vmem:[#allocation5 + $0x18] sm:$0xff] (!%p2376_p5) }
 0x613   : > { %1555 = vst.msk [vmem:[#allocation5 + $0x8] sm:$0xff] %vm1553_vm9, %v1508_v10 }
 0x615   : > { %v2706_v39 = vpop.eup (!%p2376_p5), %2705 }
 0x616   : > { %v1516_v44 = vpop.permute.xlu0 %1515  ;;  %v1953_v15 = vld [vmem:[#allocation5 + $0x38] sm:$0xff] (!%p2376_p5)  ;;  %2026 = vperm.xlu1 (!%p2376_p5), %2704, %v2706_v39  }
 0x617   : > { %1559 = vst.msk [vmem:[#allocation5 + $0x28] sm:$0xff] %vm1553_vm9, %v1516_v44  ;;  %2709 = vrcp.f32 (!%p2376_p5), %v1953_v15  ;;  %v1989_v44 = vld [vmem:[#allocation6 + $0x58] sm:$0xff] (!%p2376_p5) }
 0x61a   : > { %v1528_v38 = vpop.permute.xlu0 %1527  ;;  %v1526_v3 = vpop.permute.xlu1 %1525  ;;  %v1947_v52 = vld [vmem:[#allocation5 + $0x8] sm:$0xff] (!%p2376_p5) }
 0x61b   : > { %1565 = vst.msk [vmem:[#allocation5 + $0x58] sm:$0xff] %vm1553_vm9, %v1528_v38  ;;  %1564 = vst.msk [vmem:[#allocation5 + $0x50] sm:$0xff] %vm1553_vm9, %v1526_v3  ;;  %v2708_v31 = vpop.eup (!%p2376_p5), %2707  ;;  %v1990_v38 = vld [vmem:[#allocation6 + $0x60] sm:$0xff] (!%p2376_p5) }
 0x61c   : > { %2016 = vperm.xlu0 (!%p2376_p5), %2703, %v2708_v31  }
 0x61e   : > { %v1951_v28 = vld [vmem:[#allocation5 + $0x28] sm:$0xff] (!%p2376_p5) }
 0x61f   : > { %2711 = vrcp.f32 (!%p2376_p5), %v1951_v28  ;;  %v1993_v28 = vld [vmem:[#allocation6 + $0x78] sm:$0xff] (!%p2376_p5) }
 0x621   : > { %v2710_v16 = vpop.eup (!%p2376_p5), %2709 }
 0x622   : > { %v1957_v35 = vld [vmem:[#allocation5 + $0x58] sm:$0xff] (!%p2376_p5)  ;;  %v1956_v56 = vld [vmem:[#allocation5 + $0x50] sm:$0xff] (!%p2376_p5)  ;;  %2031 = vperm.xlu1 (!%p2376_p5), %2704, %v2710_v16  }
 0x623   : > { %v1980_v16 = vld [vmem:[#allocation6 + $0x10] sm:$0xff] (!%p2376_p5) }
 0x624   : > { %v1524_v19 = vpop.permute.xlu0 %1523 }
 0x625   : > { %1563 = vst.msk [vmem:[#allocation5 + $0x48] sm:$0xff] %vm1553_vm9, %v1524_v19 }
 0x628   : > { %v1532_v34 = vpop.permute.xlu0 %1531 }
 0x629   : > { %1567 = vst.msk [vmem:[#allocation5 + $0x68] sm:$0xff] %vm1553_vm9, %v1532_v34  ;;  %v2712_v46 = vpop.eup (!%p2376_p5), %2711 }
 0x62a   : > { %v1522_v50 = vpop.permute.xlu1 %1521  ;;  %2021 = vperm.xlu0 (!%p2376_p5), %2703, %v2712_v46  }
 0x62b   : > { %1562 = vst.msk [vmem:[#allocation5 + $0x40] sm:$0xff] %vm1553_vm9, %v1522_v50 }
 0x62c   : > { %v1536_v33 = vpop.permute.xlu0 %1535  ;;  %v1955_v49 = vld [vmem:[#allocation5 + $0x48] sm:$0xff] (!%p2376_p5) }
 0x62d   : > { %1569 = vst.msk [vmem:[#allocation5 + $0x78] sm:$0xff] %vm1553_vm9, %v1536_v33  ;;  %1945 = sbr.rel (%p2376_p5) target bundleno = 1856 (0x740), region = 60  ;;  %2713 = vrcp.f32 (!%p2376_p5), %v1955_v49  ;;  %v1991_v33 = vld [vmem:[#allocation6 + $0x68] sm:$0xff] (!%p2376_p5)  ;;  %v1978_v49 = vld [vmem:[#allocation6] sm:$0xff] (!%p2376_p5) }
 0x62e   : > { %v1530_v53 = vpop.permute.xlu1 %1529 }
 0x62f   : > { %1566 = vst.msk [vmem:[#allocation5 + $0x60] sm:$0xff] %vm1553_vm9, %v1530_v53  ;;  %v1992_v53 = vld [vmem:[#allocation6 + $0x70] sm:$0xff] (!%p2376_p5) }
 0x630   : > { %v1959_v2 = vld [vmem:[#allocation5 + $0x68] sm:$0xff] (!%p2376_p5) }
 0x632   : > { %v1534_v59 = vpop.permute.xlu1 %1533  ;;  %v1954_v25 = vld [vmem:[#allocation5 + $0x40] sm:$0xff] (!%p2376_p5) }
 0x633   : > { %1568 = vst.msk [vmem:[#allocation5 + $0x70] sm:$0xff] %vm1553_vm9, %v1534_v59  ;;  %2715 = vrcp.f32 (!%p2376_p5), %v1954_v25 }
 0x634   : > { %2717 = vrcp.f32 %v1957_v35  ;;  %v1961_v62 = vld [vmem:[#allocation5 + $0x78] sm:$0xff] }
 0x635   : > { %2719 = vrcp.f32 %v1956_v56 }
 0x636   : > { %v1958_v36 = vld [vmem:[#allocation5 + $0x60] sm:$0xff]  ;;  %2721 = vrcp.f32 %v1959_v2  ;;  %v1981_v2 = vld [vmem:[#allocation6 + $0x18] sm:$0xff] }
 0x637   : > { %2723 = vrcp.f32 %v1958_v36  ;;  %v2714_v20 = vpop.eup %2713 }
 0x638   : > { %2725 = vrcp.f32 %v1961_v62  ;;  %2041 = vperm.xlu1 %2704, %v2714_v20  }
 0x63a   : > { %v1960_v13 = vld [vmem:[#allocation5 + $0x70] sm:$0xff] }
 0x63b   : > { %2727 = vrcp.f32 %v1960_v13 }
 0x63c   : > { %2729 = vrcp.f32 %v1947_v52 }
 0x63d   : > { %v2716_v43 = vpop.eup %2715  ;;  %2731 = vrcp.f32 %v1946_v1 }
 0x63e   : > { %v2718_v61 = vpop.eup %2717  ;;  %2036 = vperm.xlu0 %2703, %v2716_v43   ;;  %2733 = vrcp.f32 %v1949_v63 }
 0x63f   : > { %v2720_v47 = vpop.eup %2719  ;;  %2051 = vperm.xlu1 %2704, %v2718_v61   ;;  %2735 = vrcp.f32 %v1948_v4 }
 0x640   : > { %v2722_v7 = vpop.eup %2721 }
 0x641   : > { %v2724_v24 = vpop.eup %2723 }
 0x642   : > { %2046 = vperm.xlu0 %2703, %v2720_v47   ;;  %v2726_v60 = vpop.eup %2725 }
 0x643   : > { %2061 = vperm.xlu1 %2704, %v2722_v7  }
 0x645   : > { %v2728_v17 = vpop.eup %2727 }
 0x646   : > { %2056 = vperm.xlu0 %2703, %v2724_v24   ;;  %v2730_v54 = vpop.eup %2729 }
 0x647   : > { %2071 = vperm.xlu1 %2704, %v2726_v60   ;;  %v2732_v40 = vpop.eup %2731 }
 0x648   : > { %v2734_v51 = vpop.eup %2733 }
 0x649   : > { %v2736_v14 = vpop.eup %2735 }
 0x64a   : > { %2066 = vperm.xlu0 %2703, %v2728_v17  }
 0x64b   : > { %2001 = vperm.xlu1 %2704, %v2730_v54  }
 0x64e   : > { %1996 = vperm.xlu0 %2703, %v2732_v40  }
 0x64f   : > { %2011 = vperm.xlu1 %2704, %v2734_v51  }
 0x652   : > { %2006 = vperm.xlu0 %2703, %v2736_v14  }
 0x695   : > { %v2027_v22 = vpop.permute.xlu1 %2026 }
 0x696   : > { %v2080_v6 = vmul.f32 %v2027_v22, %v1984_v5 }
 0x69b   : > { %v2017_v26 = vpop.permute.xlu0 %2016 }
 0x69c   : > { %v2078_v23 = vmul.f32 %v2017_v26, %v1982_v30 }
 0x69e   : > { %2098 = vrot.lane.b32.xlu0 %v2078_v23, %s2861_s27 }
 0x6a1   : > { %v2032_v41 = vpop.permute.xlu1 %2031 }
 0x6a2   : > { %2102 = vrot.lane.b32.xlu0 %v2080_v6, %s2861_s27  ;;  %v2081_v45 = vmul.f32 %v2032_v41, %v1985_v57 }
 0x6a9   : > { %v2022_v21 = vpop.permute.xlu0 %2021 }
 0x6aa   : > { %v2079_v37 = vmul.f32 %v2022_v21, %v1983_v9 }
 0x6ac   : > { %2100 = vrot.lane.b32.xlu1 %v2079_v37, %s2861_s27 }
 0x6b0   : > { %2104 = vrot.lane.b32.xlu1 %v2081_v45, %s2861_s27 }
 0x6b7   : > { %v2042_v32 = vpop.permute.xlu1 %2041 }
 0x6b8   : > { %v2083_v48 = vmul.f32 %v2042_v32, %v1987_v58 }
 0x6ba   : > { %2121 = vrot.lane.b32.xlu1 %v2083_v48, %s2862_s19 }
 0x6bd   : > { %v2037_v42 = vpop.permute.xlu0 %2036 }
 0x6be   : > { %v2082_v55 = vmul.f32 %v2037_v42, %v1986_v8  ;;  %v2052_v0 = vpop.permute.xlu1 %2051 }
 0x6bf   : > { %v2085_v34 = vmul.f32 %v2052_v0, %v1989_v44 }
 0x6c0   : > { %2119 = vrot.lane.b32.xlu0 %v2082_v55, %s2862_s19 }
 0x6c1   : > { %v2047_v27 = vpop.permute.xlu0 %2046  ;;  %2125 = vrot.lane.b32.xlu1 %v2085_v34, %s2862_s19 }
 0x6c2   : > { %v2084_v10 = vmul.f32 %v2047_v27, %v1988_v18  ;;  %v2062_v3 = vpop.permute.xlu1 %2061 }
 0x6c3   : > { %v2087_v29 = vmul.f32 %v2062_v3, %v1991_v33 }
 0x6c4   : > { %2123 = vrot.lane.b32.xlu0 %v2084_v10, %s2862_s19 }
 0x6c5   : > { %v2057_v19 = vpop.permute.xlu0 %2056  ;;  %2142 = vrot.lane.b32.xlu1 %v2087_v29, %s2863_s21 }
 0x6c6   : > { %v2086_v50 = vmul.f32 %v2057_v19, %v1990_v38  ;;  %v2072_v59 = vpop.permute.xlu1 %2071 }
 0x6c7   : > { %v2089_v39 = vmul.f32 %v2072_v59, %v1993_v28 }
 0x6c8   : > { %2140 = vrot.lane.b32.xlu0 %v2086_v50, %s2863_s21 }
 0x6c9   : > { %v2067_v12 = vpop.permute.xlu0 %2066  ;;  %2146 = vrot.lane.b32.xlu1 %v2089_v39, %s2863_s21 }
 0x6ca   : > { %v2088_v15 = vmul.f32 %v2067_v12, %v1992_v53  ;;  %v2002_v25 = vpop.permute.xlu1 %2001 }
 0x6cb   : > { %v2075_v35 = vmul.f32 %v2002_v25, %v1979_v11 }
 0x6cc   : > { %2144 = vrot.lane.b32.xlu0 %v2088_v15, %s2863_s21 }
 0x6cd   : > { %v1997_v56 = vpop.permute.xlu0 %1996  ;;  %2091 = vst.msk [vmem:[%s3013_s18 + $0x8] sm:$0xff] %vm826_vm6, %v2075_v35 }
 0x6ce   : > { %v2074_v31 = vmul.f32 %v1997_v56, %v1978_v49  ;;  %v2012_v36 = vpop.permute.xlu1 %2011 }
 0x6cf   : > { %v2077_v46 = vmul.f32 %v2012_v36, %v1981_v2 }
 0x6d0   : > { %2090 = vst.msk [vmem:[%s3013_s18] sm:$0xff] %vm826_vm6, %v2074_v31 }
 0x6d1   : > { %v2007_v62 = vpop.permute.xlu0 %2006  ;;  %2093 = vst.msk [vmem:[%s3013_s18 + $0x18] sm:$0xff] %vm826_vm6, %v2077_v46 }
 0x6d2   : > { %v2076_v20 = vmul.f32 %v2007_v62, %v1980_v16 }
 0x6d4   : > { %2092 = vst.msk [vmem:[%s3013_s18 + $0x10] sm:$0xff] %vm826_vm6, %v2076_v20 }
 0x710   : > { %v2099_v13 = vpop.permute.xlu0 %2098 }
 0x711   : > { %2111 = vst.msk [vmem:[%s3013_s18] sm:$0xff] %vm2110_vm10, %v2099_v13 }
 0x714   : > { %v2103_v52 = vpop.permute.xlu0 %2102 }
 0x715   : > { %2113 = vst.msk [vmem:[%s3013_s18 + $0x10] sm:$0xff] %vm2110_vm10, %v2103_v52 }
 0x71e   : > { %v2101_v43 = vpop.permute.xlu1 %2100 }
 0x71f   : > { %2112 = vst.msk [vmem:[%s3013_s18 + $0x8] sm:$0xff] %vm2110_vm10, %v2101_v43 }
 0x722   : > { %v2105_v61 = vpop.permute.xlu1 %2104 }
 0x723   : > { %2114 = vst.msk [vmem:[%s3013_s18 + $0x18] sm:$0xff] %vm2110_vm10, %v2105_v61 }
 0x72c   : > { %v2122_v47 = vpop.permute.xlu1 %2121 }
 0x72d   : > { %2133 = vst.msk [vmem:[%s3013_s18 + $0x8] sm:$0xff] %vm2131_vm11, %v2122_v47 }
 0x732   : > { %v2120_v1 = vpop.permute.xlu0 %2119 }
 0x733   : > { %2132 = vst.msk [vmem:[%s3013_s18] sm:$0xff] %vm2131_vm11, %v2120_v1  ;;  %v2126_v7 = vpop.permute.xlu1 %2125 }
 0x734   : > { %2135 = vst.msk [vmem:[%s3013_s18 + $0x18] sm:$0xff] %vm2131_vm11, %v2126_v7 }
 0x736   : > { %v2124_v63 = vpop.permute.xlu0 %2123 }
 0x737   : > { %2134 = vst.msk [vmem:[%s3013_s18 + $0x10] sm:$0xff] %vm2131_vm11, %v2124_v63  ;;  %v2143_v24 = vpop.permute.xlu1 %2142 }
 0x738   : > { %2154 = vst.msk [vmem:[%s3013_s18 + $0x8] sm:$0xff] %vm2152_vm12, %v2143_v24 }
 0x73a   : > { %v2141_v4 = vpop.permute.xlu0 %2140 }
 0x73b   : > { %2153 = vst.msk [vmem:[%s3013_s18] sm:$0xff] %vm2152_vm12, %v2141_v4  ;;  %v2147_v17 = vpop.permute.xlu1 %2146 }
 0x73c   : > { %2156 = vst.msk [vmem:[%s3013_s18 + $0x18] sm:$0xff] %vm2152_vm12, %v2147_v17 }
 0x73e   : > { %v2145_v60 = vpop.permute.xlu0 %2144 }
 0x73f   : > { %2155 = vst.msk [vmem:[%s3013_s18 + $0x10] sm:$0xff] %vm2152_vm12, %v2145_v60 }
 0x740 PF: > { %s2379_s9 = sshll.u32 %s2831_s29, 3  ;;  %s2173_s30 = sshll.u32 %s3013_s18, 4  ;;  %s3710_s30 = int_to_ptr.vmem [resolvable:$true] %s2173_s30 }
 0x741   : > { %s2170_s13 = sadd.s32 %s2379_s9, %s2994_s11  ;;  %s3809_s14 = sand.u32 1, %s2815_s25  }
 0x742   : > { %s2380_s26 = sshll.u32 %s2170_s13, 7  ;;  %s3719_s17 = scalar_lea.sflag [#allocation8], %s3809_s14 }
 0x743   : > { %s3715_s28 = scalar_lea.hbm %s3784_s7, %s2380_s26  ;;  %s2737_s22 = scalar_lea.vmem %s3710_s30, 512 }
 0x744   : > { %p2738_p8 = scmp.ne.s32.totalorder %s3710_s30, %s2737_s22  ;;  %s2864_s29 = smov [#allocation7]  }
 0x745   : > { %s2741_s11 = sshll.u32 %s2864_s29, 4  ;;  %s2742_s11 = int_to_ptr.vmem [resolvable:$false] %s2741_s11 }
 0x746   : > { %p2739_p9 = pnand %p2738_p8, %p2969_p6  ;;  %s2743_s18 = scalar_lea.vmem %s2742_s11, 1024 }
 0x747   : > { %p2744_p11 = scmp.lt.s32.totalorder %s3710_s30, %s2742_s11  ;;  %p2745_p12 = scmp.lt.s32.totalorder %s2743_s18, %s2737_s22 }
 0x748   : > { %p2740_p10 = pneg %p2739_p9 }
 0x749   : > { %p2746_p13 = por %p2745_p12, %p2744_p11 }
 0x74b   : > { %p2747_p0 = pnand %p2746_p13, %p2740_p10 }
 0x74d   : > { %2750 = shalt.err (!%p2747_p0)
}
 0x74e   : > { %s2751_s23 = scalar_lea.hbm %s3715_s28, 512  ;;  %s2755_s12 = scalar_lea.hbm %s3784_s7, 2048 }
 0x74f   : > { %p2752_p1 = scmp.ne.s32.totalorder %s3715_s28, %s2751_s23  ;;  %p2756_p4 = scmp.lt.u32.totalorder %s3715_s28, %s3784_s7 }
 0x750   : > { %p2757_p5 = scmp.lt.u32.totalorder %s2755_s12, %s2751_s23  ;;  %p2759_p9 = scmp.lt.u32.totalorder %s2751_s23, %s3715_s28 }
 0x751   : > { %p2753_p2 = pnand %p2752_p1, %p2969_p6 }
 0x752   : > { %p2758_p8 = por %p2757_p5, %p2756_p4 }
 0x753   : > { %p2754_p3 = pneg %p2753_p2 }
 0x754   : > { %p2760_p10 = por %p2759_p9, %p2758_p8 }
 0x756   : > { %p2761_p11 = pnand %p2760_p10, %p2754_p3 }
 0x758   : > { %2764 = shalt.err (!%p2761_p11)
}
 0x759   : > { %s2865_s19 = smov 128   ;;  %s2866_s21 = smov 8  }
 0x75a   : > { %2523 = dma.vmem_to_hbm [thread:$0]  (%p2969_p6), %s3710_s30, 512, %s3715_s28, %s3719_s17, %s2865_s19, %s2865_s19, %s2866_s21  }
 0x75b PF: > { %s3810_s9 = sld [smem:[#allocation15_spill]]  ;;  %s3811_s13 = sld [smem:[#allocation10_spill]] }
 0x761   : > { %p2529_p12 = scmp.ge.s32.totalorder %s3810_s9, 2  ;;  %s2188_s8 = sand.u32 1, %s3811_s13  }
 0x762   : > { %s2189_s24 = scalar_lea.sflag [#allocation8], %s2188_s8 }
 0x763   : > { %p2526_p13 = pnand %p2529_p12, %p2976_p7 }
 0x765   : > { %2806 = dma.done.wait (!%p2526_p13), %s2189_s24, 512  }
 0x766   : > { %2808 = vsyncadd (!%p2526_p13), %s2189_s24, 4294966784  ;;  %s20_s10 = sadd.s32 1, %s3810_s9   ;;  %s3813_s14 = sld [smem:[#allocation11_spill]] }
 0x767   : > { %p17_p0 = scmp.ge.s32.totalorder %s20_s10, 10   ;;  %s3814_s26 = sld [smem:[#allocation20_spill]] }
 0x768   : > { %s3815_s27 = sld [smem:[#allocation12_spill]]  ;;  %s3816_s28 = sld [smem:[#allocation13_spill]] }
 0x769   : > { %s3817_s29 = sld [smem:[#allocation14_spill]]  ;;  %s3818_s30 = sld [smem:[#allocation16_spill]] }
 0x76a   : > { %s3819_s8 = sld [smem:[#allocation17_spill]]  ;;  %s3820_s9 = sld [smem:[#allocation19_spill]] }
 0x76b   : > { %s3821_s24 = smov %s2815_s25  ;;  %19 = sbr.rel (!%p17_p0) target bundleno = 6 (0x6), region = 111 }
 0x76c   : > { %s3822_s25 = smov %s3813_s14 }
 0x772   :  { %2194 = vsyncpa [#allocation8], 1 }
 0x773   :  { %2196 = vsyncpa [#allocation8 + $0x1], 1 }

</bundles_post_ra>
